<compile_context>
chip_gen: v6e
topology: v6e:2x2x1
jax: 0.10.0
libtpu: 0.0.40
codegen_flags: <defaults>
</compile_context>

<pallas_src>
import functools

import jax
import jax.numpy as jnp
import numpy as np
from jax import lax
from jax.experimental import pallas as pl
from jax.experimental.pallas import tpu as pltpu


def _cdiv(a, b):
    return (a + b - 1) // b


def _round_up(a, b):
    return _cdiv(a, b) * b


def _gated_attention_kernel(
    # inputs
    x_ref, w1_ref, b1_ref, wg_ref, bg_ref, wa_ref, ba_ref,
    # outputs (m/l/acc double as the per-core online-softmax accumulators)
    scores_ref, m_ref, l_ref, acc_ref,
    *, n_valid, tile_rows, a_dim, needs_mask,
):
    c = pl.program_id(0)                 # core split (parallel)
    i = pl.program_id(1)                 # patch-tile index within this core (arbitrary)
    tiles_per_core = pl.num_programs(1)

    @pl.when(i == 0)
    def _init():
        m_ref[...] = jnp.full_like(m_ref, -jnp.inf)
        l_ref[...] = jnp.zeros_like(l_ref)
        acc_ref[...] = jnp.zeros_like(acc_ref)

    # Global row offset of this (logical) tile — used for tail masking.
    tile_idx = c * tiles_per_core + i
    row0 = tile_idx * tile_rows

    # ---- feature_projection: Linear + ReLU (bf16 MXU in / f32 accumulate) ----
    x = x_ref[...].astype(jnp.bfloat16)                                  # f32 stream, per-tile cast
    h = jnp.dot(x, w1_ref[...], preferred_element_type=jnp.float32) + b1_ref[...]
    h = jnp.maximum(h, 0.0)                                              # (tm, H) f32

    if needs_mask:
        # Zero-mask rows past the bag end so undefined OOB x data can never
        # produce NaN/Inf that leaks into the aggregation (0 * NaN = NaN otherwise).
        row = row0 + lax.broadcasted_iota(jnp.int32, (h.shape[0], 1), 0)
        h = jnp.where(row < n_valid, h, 0.0)
    h_b = h.astype(jnp.bfloat16)

    # ---- gated attention branches: one fused 2A-wide MXU matmul, then tanh/sigmoid ----
    g = jnp.dot(h_b, wg_ref[...], preferred_element_type=jnp.float32) + bg_ref[...]
    a_t = jnp.tanh(g[:, :a_dim])
    a_s = 0.5 * jnp.tanh(0.5 * g[:, a_dim:]) + 0.5                       # exact sigmoid, 1 EUP op
    a_g = a_t * a_s                                                      # (tm, A) f32

    # ---- attention scores, produced lane-dense as (B, tm) (no transpose, unmasked vst) ----
    scores = lax.dot_general(
        wa_ref[...], a_g, (((1,), (1,)), ((), ())),
        preferred_element_type=jnp.float32) + ba_ref[...]                # (B, tm)
    if needs_mask:
        col = row0 + lax.broadcasted_iota(jnp.int32, scores.shape, 1)
        scores = jnp.where(col < n_valid, scores, -1e30)
    scores_ref[...] = scores            # raw scores; exact softmax done in the wrapper

    # ---- online softmax statistics + un-normalised aggregated features (per core) ----
    tile_max = jnp.max(scores, axis=1, keepdims=True)                    # (B, 1)
    m_old = m_ref[0]
    m_new = jnp.maximum(m_old, tile_max)
    alpha = jnp.exp(m_old - m_new)
    p = jnp.exp(scores - m_new)                                          # (B, tm) f32
    l_ref[0] = alpha * l_ref[0] + jnp.sum(p, axis=1, keepdims=True)
    acc_ref[0] = alpha * acc_ref[0] + lax.dot_general(
        p.astype(jnp.bfloat16), h_b, (((1,), (0,)), ((), ())),
        preferred_element_type=jnp.float32)                              # (B, H) f32
    m_ref[0] = m_new


def gated_attention_forward(x, params, *, tile_n=1024):
    """x: (N, input_dim) float32.  Returns (prediction (1,1), attention (B, N)).

    tile_n=1024 keeps the f32 x double-buffer + activations under ~35 MiB at D=2048,
    safe on v7x (64 MiB VMEM); on v5e/v6e (128 MiB) tile_n can be raised to 2048+.
    """
    w1, b1, wt, bt, ws, bs, wa, ba, wc, bc = params
    n, d = x.shape
    h_dim = w1.shape[1]
    a_dim = wt.shape[1]
    b_br = wa.shape[0]

    # --- tiling: leading 2-way split (v7x megacore) x per-core patch tiles -------------
    n_split = 2
    total_tiles = _round_up(max(_cdiv(n, tile_n), n_split), n_split)
    tm = _round_up(_cdiv(n, total_tiles), 128)        # lane-dense score rows
    n_pad = tm * total_tiles
    tiles_per_core = total_tiles // n_split
    needs_mask = (n_pad != n)
    last_x_block = _cdiv(n, tm) - 1                   # clamp target for fully-empty tiles

    # Fuse the two gate branches into one 256-wide resident weight (tiny, done per call).
    wg = jnp.concatenate([wt, ws], axis=1).astype(jnp.bfloat16)          # (H, 2A)
    bg = jnp.concatenate([bt, bs], axis=1)                               # (1, 2A)

    kernel = functools.partial(
        _gated_attention_kernel,
        n_valid=n, tile_rows=tm, a_dim=a_dim, needs_mask=needs_mask)

    const = lambda c, i: (0, 0)
    # Clamp so a trailing tile that lies entirely past the bag never issues an OOB block
    # DMA; its rows are fully masked in-kernel so it contributes exactly zero.
    x_map = lambda c, i: (jnp.minimum(c * tiles_per_core + i, last_x_block), 0)

    grid_spec = pltpu.PrefetchScalarGridSpec(
        num_scalar_prefetch=0,
        grid=(n_split, tiles_per_core),
        in_specs=[
            pl.BlockSpec((tm, d), x_map),                         # x tile, streamed f32
            pl.BlockSpec((d, h_dim), const),                      # w1 bf16 (resident)
            pl.BlockSpec((1, h_dim), const),                      # b1
            pl.BlockSpec((h_dim, 2 * a_dim), const),              # [wt | ws] bf16 (resident)
            pl.BlockSpec((1, 2 * a_dim), const),                  # [bt | bs]
            pl.BlockSpec((b_br, a_dim), const),                   # wa (PyTorch (B, A) layout)
            pl.BlockSpec((b_br, 1), const),                       # ba
        ],
        out_specs=[
            pl.BlockSpec((b_br, tm), lambda c, i: (0, c * tiles_per_core + i)),   # raw scores
            pl.BlockSpec((1, b_br, 1), lambda c, i: (c, 0, 0)),                   # partial m
            pl.BlockSpec((1, b_br, 1), lambda c, i: (c, 0, 0)),                   # partial l
            pl.BlockSpec((1, b_br, h_dim), lambda c, i: (c, 0, 0)),               # partial acc
        ],
    )

    # Scoped-VMEM budget: f32 x double-buffer + resident weights + activation headroom,
    # capped at 48 MiB so it always fits v7x's 64 MiB per-TC VMEM.
    vmem_bytes = (2 * tm * d * 4
                  + 2 * d * h_dim * 2 + 2 * h_dim * 2 * a_dim * 2
                  + 2 * b_br * tm * 4
                  + 10 * tm * max(h_dim, 2 * a_dim) * 4
                  + (4 << 20))
    vmem_limit = int(min(max(vmem_bytes, 32 << 20), 48 << 20))

    raw_scores, m_part, l_part, acc_part = pl.pallas_call(
        kernel,
        grid_spec=grid_spec,
        out_shape=(
            jax.ShapeDtypeStruct((b_br, n_pad), jnp.float32),
            jax.ShapeDtypeStruct((n_split, b_br, 1), jnp.float32),
            jax.ShapeDtypeStruct((n_split, b_br, 1), jnp.float32),
            jax.ShapeDtypeStruct((n_split, b_br, h_dim), jnp.float32),
        ),
        compiler_params=pltpu.CompilerParams(
            dimension_semantics=("parallel", "arbitrary"),
            vmem_limit_bytes=vmem_limit,
        ),
    )(x, w1.astype(jnp.bfloat16), b1, wg, bg, wa, ba)

    # ---- tiny exact f32 epilogue (O(N + H)): 2-way online-softmax combine, exact ----
    # softmax over raw scores, classifier Linear(H*B -> 1) + sigmoid.
    m_max = jnp.max(m_part, axis=0)                       # (B, 1)
    scale = jnp.exp(m_part - m_max)                       # (2, B, 1)
    l = jnp.sum(scale * l_part, axis=0)                   # (B, 1)
    acc = jnp.sum(scale * acc_part, axis=0)               # (B, H)
    agg = acc / l                                         # exact normalisation
    attention = jax.nn.softmax(raw_scores[:, :n], axis=1)
    logit = jnp.sum(agg * wc) + bc[0, 0]
    prediction = jax.nn.sigmoid(logit).reshape(1, 1)
    return prediction, attention


def init_params(key, input_dim, hidden_dim, attention_dim, branches):
    """PyTorch-Linear-style init U(-1/sqrt(fan_in), 1/sqrt(fan_in)).

    Storage layout:
      w1 (D, H), b1 (1, H)   feature_projection (weight pre-transposed for x @ W)
      wt (H, A), bt (1, A)   attention_tanh
      ws (H, A), bs (1, A)   attention_sigmoid
      wa (B, A), ba (B, 1)   attention_weights (PyTorch weight layout)
      wc (B, H), bc (1, 1)   classifier ((1, B*H) weight viewed row-major as (B, H))
    """
    def linear(k, fan_in, shape_w, shape_b):
        kw, kb = jax.random.split(k)
        bound = 1.0 / np.sqrt(fan_in)
        w = jax.random.uniform(kw, shape_w, jnp.float32, -bound, bound)
        b = jax.random.uniform(kb, shape_b, jnp.float32, -bound, bound)
        return w, b

    k1, k2, k3, k4, k5 = jax.random.split(key, 5)
    w1, b1 = linear(k1, input_dim, (input_dim, hidden_dim), (1, hidden_dim))
    wt, bt = linear(k2, hidden_dim, (hidden_dim, attention_dim), (1, attention_dim))
    ws, bs = linear(k3, hidden_dim, (hidden_dim, attention_dim), (1, attention_dim))
    wa, ba = linear(k4, attention_dim, (branches, attention_dim), (branches, 1))
    wc, bc = linear(k5, hidden_dim * branches, (branches, hidden_dim), (1, 1))
    return (w1, b1, wt, bt, ws, bs, wa, ba, wc, bc)


def gated_attention_reference(x, params):
    """Pure-JAX f32 reference matching the PyTorch module."""
    w1, b1, wt, bt, ws, bs, wa, ba, wc, bc = params
    h = jax.nn.relu(x @ w1 + b1)
    a_t = jnp.tanh(h @ wt + bt)
    a_s = jax.nn.sigmoid(h @ ws + bs)
    scores = (a_t * a_s) @ wa.T + ba.T                 # (N, B)
    attn = jax.nn.softmax(scores.T, axis=1)            # (B, N)
    agg = attn @ h                                     # (B, H)
    logit = jnp.sum(agg * wc) + bc[0, 0]
    pred = jax.nn.sigmoid(logit).reshape(1, 1)
    return pred, attn


if __name__ == "__main__":
    # Small shapes consistent with the module (defaults 2048/128/128/1).  N=600 with
    # tile_n=128 exercises: multiple tiles per core, a partial (masked) tail tile, one
    # fully-empty clamped tile, and the 2-way online-softmax combine.  Real workloads
    # should use the default tile_n=1024.
    N, INPUT_DIM, HIDDEN_DIM, ATTN_DIM, BRANCHES = 600, 256, 128, 128, 1

    key = jax.random.PRNGKey(0)
    kx, kp = jax.random.split(key)
    x = jax.random.normal(kx, (N, INPUT_DIM), jnp.float32)
    params = init_params(kp, INPUT_DIM, HIDDEN_DIM, ATTN_DIM, BRANCHES)

    fwd = jax.jit(functools.partial(gated_attention_forward, tile_n=128))
    prediction, attention = fwd(x, params)
    jax.block_until_ready((prediction, attention))

    assert prediction.shape == (1, 1)
    assert attention.shape == (BRANCHES, N)

    # Correctness vs pure-JAX f32 reference (kernel matmuls run in bf16 -> relaxed tols).
    ref_pred, ref_attn = gated_attention_reference(x, params)
    np.testing.assert_allclose(np.asarray(attention).sum(axis=1), 1.0, atol=1e-3)
    np.testing.assert_allclose(np.asarray(attention), np.asarray(ref_attn), atol=5e-4)
    np.testing.assert_allclose(np.asarray(prediction), np.asarray(ref_pred), atol=2e-2)

    print("KERNEL_OK")
</pallas_src>

<mosaic_0001>
module attributes {stable_mosaic.version = 11 : i64} {
  func.func @_gated_attention_kernel(%arg0: i32, %arg1: i32, %arg2: memref<128x256xf32, #tpu.memory_space<vmem>>, %arg3: memref<256x128xbf16, #tpu.memory_space<vmem>>, %arg4: memref<1x128xf32, #tpu.memory_space<vmem>>, %arg5: memref<128x256xbf16, #tpu.memory_space<vmem>>, %arg6: memref<1x256xf32, #tpu.memory_space<vmem>>, %arg7: memref<1x128xf32, #tpu.memory_space<vmem>>, %arg8: memref<1x1xf32, #tpu.memory_space<vmem>>, %arg9: memref<1x128xf32, #tpu.memory_space<vmem>>, %arg10: memref<1x1x1xf32, #tpu.memory_space<vmem>>, %arg11: memref<1x1x1xf32, #tpu.memory_space<vmem>>, %arg12: memref<1x1x128xf32, #tpu.memory_space<vmem>>) attributes {dimension_semantics = [#tpu.dimension_semantics<parallel>, #tpu.dimension_semantics<arbitrary>], iteration_bounds = array<i64: 2, 3>, scalar_prefetch = 0 : i64, scratch_operands = 0 : i64, tpu.core_type = #tpu.core_type<tc>, window_params = [{transform_indices = @transform_0, window_bounds = array<i64: 128, 256>}, {pipeline_mode = #tpu.pipeline_mode<synchronous>, transform_indices = @transform_1, window_bounds = array<i64: 256, 128>}, {pipeline_mode = #tpu.pipeline_mode<synchronous>, transform_indices = @transform_2, window_bounds = array<i64: 1, 128>}, {pipeline_mode = #tpu.pipeline_mode<synchronous>, transform_indices = @transform_3, window_bounds = array<i64: 128, 256>}, {pipeline_mode = #tpu.pipeline_mode<synchronous>, transform_indices = @transform_4, window_bounds = array<i64: 1, 256>}, {pipeline_mode = #tpu.pipeline_mode<synchronous>, transform_indices = @transform_5, window_bounds = array<i64: 1, 128>}, {pipeline_mode = #tpu.pipeline_mode<synchronous>, transform_indices = @transform_6, window_bounds = array<i64: 1, 1>}, {transform_indices = @transform_7, window_bounds = array<i64: 1, 128>}, {transform_indices = @transform_8, window_bounds = array<i64: 1, 1, 1>}, {transform_indices = @transform_9, window_bounds = array<i64: 1, 1, 1>}, {transform_indices = @transform_10, window_bounds = array<i64: 1, 1, 128>}]} {
    %c0_i32 = arith.constant 0 : i32
    %0 = arith.cmpi eq, %arg1, %c0_i32 : i32
    %1 = arith.extui %0 : i1 to i32
    %c0_i32_0 = arith.constant 0 : i32
    %2 = arith.cmpi ne, %1, %c0_i32_0 : i32
    scf.if %2 {
      %cst_46 = arith.constant 0xFF800000 : f32
      %86 = vector.broadcast %cst_46 : f32 to vector<1x1x1xf32>
      %c0_47 = arith.constant 0 : index
      %c0_48 = arith.constant 0 : index
      %c0_49 = arith.constant 0 : index
      %87 = vector.load %arg10[%c0_47, %c0_48, %c0_49] : memref<1x1x1xf32, #tpu.memory_space<vmem>>, vector<1x1x1xf32>
      tpu.vector_store %arg10[%c0_47, %c0_48, %c0_49], %86 {strides = array<i32>} : memref<1x1x1xf32, #tpu.memory_space<vmem>>, vector<1x1x1xf32>,
      %cst_50 = arith.constant 0.000000e+00 : f32
      %88 = vector.broadcast %cst_50 : f32 to vector<1x1x1xf32>
      %c0_51 = arith.constant 0 : index
      %c0_52 = arith.constant 0 : index
      %c0_53 = arith.constant 0 : index
      %89 = vector.load %arg11[%c0_51, %c0_52, %c0_53] : memref<1x1x1xf32, #tpu.memory_space<vmem>>, vector<1x1x1xf32>
      tpu.vector_store %arg11[%c0_51, %c0_52, %c0_53], %88 {strides = array<i32>} : memref<1x1x1xf32, #tpu.memory_space<vmem>>, vector<1x1x1xf32>,
      %cst_54 = arith.constant 0.000000e+00 : f32
      %90 = vector.broadcast %cst_54 : f32 to vector<1x1x128xf32>
      %c0_55 = arith.constant 0 : index
      %c0_56 = arith.constant 0 : index
      %c0_57 = arith.constant 0 : index
      %91 = vector.load %arg12[%c0_55, %c0_56, %c0_57] : memref<1x1x128xf32, #tpu.memory_space<vmem>>, vector<1x1x128xf32>
      tpu.vector_store %arg12[%c0_55, %c0_56, %c0_57], %90 {strides = array<i32>} : memref<1x1x128xf32, #tpu.memory_space<vmem>>, vector<1x1x128xf32>,
    } else {
    }
    %c3_i32 = arith.constant 3 : i32
    %3 = arith.muli %arg0, %c3_i32 : i32
    %4 = arith.addi %3, %arg1 : i32
    %c128_i32 = arith.constant 128 : i32
    %5 = arith.muli %4, %c128_i32 : i32
    %c0 = arith.constant 0 : index
    %c0_1 = arith.constant 0 : index
    %6 = vector.load %arg2[%c0, %c0_1] : memref<128x256xf32, #tpu.memory_space<vmem>>, vector<128x256xf32>
    %7 = arith.truncf %6 : vector<128x256xf32> to vector<128x256xbf16>
    %c0_2 = arith.constant 0 : index
    %c0_3 = arith.constant 0 : index
    %8 = vector.load %arg3[%c0_2, %c0_3] : memref<256x128xbf16, #tpu.memory_space<vmem>>, vector<256x128xbf16>
    %cst = arith.constant dense<0.000000e+00> : vector<128x128xf32>
    %9 = tpu.matmul %7, %8, %cst {dimension_numbers = #tpu.dot_dimension_numbers<[1], [0], [0], [1], [0, 0, 1, 1], [], []>} : vector<128x256xbf16>, vector<256x128xbf16>, vector<128x128xf32> -> vector<128x128xf32>
    %c0_4 = arith.constant 0 : index
    %c0_5 = arith.constant 0 : index
    %10 = vector.load %arg4[%c0_4, %c0_5] : memref<1x128xf32, #tpu.memory_space<vmem>>, vector<1x128xf32>
    %11 = vector.broadcast %10 : vector<1x128xf32> to vector<128x128xf32>
    %12 = arith.addf %9, %11 : vector<128x128xf32>
    %cst_6 = arith.constant 0.000000e+00 : f32
    %13 = vector.broadcast %cst_6 : f32 to vector<128x128xf32>
    %14 = arith.maximumf %12, %13 : vector<128x128xf32>
    %15 = tpu.iota {dimensions = array<i32: 0>} : vector<128x1xi32>
    %16 = vector.broadcast %5 : i32 to vector<128x1xi32>
    %17 = arith.addi %16, %15 : vector<128x1xi32>
    %c600_i32 = arith.constant 600 : i32
    %18 = vector.broadcast %c600_i32 : i32 to vector<128x1xi32>
    %19 = arith.cmpi slt, %17, %18 : vector<128x1xi32>
    %cst_7 = arith.constant 0.000000e+00 : f32
    %20 = vector.shape_cast %19 : vector<128x1xi1> to vector<128x1xi1>
    %21 = vector.broadcast %20 : vector<128x1xi1> to vector<128x128xi1>
    %22 = vector.broadcast %cst_7 : f32 to vector<128x128xf32>
    %23 = arith.select %21, %14, %22 : vector<128x128xi1>, vector<128x128xf32>
    %24 = arith.truncf %23 : vector<128x128xf32> to vector<128x128xbf16>
    %c0_8 = arith.constant 0 : index
    %c0_9 = arith.constant 0 : index
    %25 = vector.load %arg5[%c0_8, %c0_9] : memref<128x256xbf16, #tpu.memory_space<vmem>>, vector<128x256xbf16>
    %cst_10 = arith.constant dense<0.000000e+00> : vector<128x256xf32>
    %26 = tpu.matmul %24, %25, %cst_10 {dimension_numbers = #tpu.dot_dimension_numbers<[1], [0], [0], [1], [0, 0, 1, 1], [], []>} : vector<128x128xbf16>, vector<128x256xbf16>, vector<128x256xf32> -> vector<128x256xf32>
    %c0_11 = arith.constant 0 : index
    %c0_12 = arith.constant 0 : index
    %27 = vector.load %arg6[%c0_11, %c0_12] : memref<1x256xf32, #tpu.memory_space<vmem>>, vector<1x256xf32>
    %28 = vector.broadcast %27 : vector<1x256xf32> to vector<128x256xf32>
    %29 = arith.addf %26, %28 : vector<128x256xf32>
    %30 = vector.extract_strided_slice %29 {offsets = [0, 0], sizes = [128, 128], strides = [1, 1]} : vector<128x256xf32> to vector<128x128xf32>
    %31 = math.tanh %30 : vector<128x128xf32>
    %32 = vector.extract_strided_slice %29 {offsets = [0, 128], sizes = [128, 128], strides = [1, 1]} : vector<128x256xf32> to vector<128x128xf32>
    %cst_13 = arith.constant 5.000000e-01 : f32
    %33 = vector.broadcast %cst_13 : f32 to vector<128x128xf32>
    %34 = arith.mulf %33, %32 : vector<128x128xf32>
    %35 = math.tanh %34 : vector<128x128xf32>
    %cst_14 = arith.constant 5.000000e-01 : f32
    %36 = vector.broadcast %cst_14 : f32 to vector<128x128xf32>
    %37 = arith.mulf %36, %35 : vector<128x128xf32>
    %cst_15 = arith.constant 5.000000e-01 : f32
    %38 = vector.broadcast %cst_15 : f32 to vector<128x128xf32>
    %39 = arith.addf %37, %38 : vector<128x128xf32>
    %40 = arith.mulf %31, %39 : vector<128x128xf32>
    %c0_16 = arith.constant 0 : index
    %c0_17 = arith.constant 0 : index
    %41 = vector.load %arg7[%c0_16, %c0_17] : memref<1x128xf32, #tpu.memory_space<vmem>>, vector<1x128xf32>
    %cst_18 = arith.constant dense<0.000000e+00> : vector<1x128xf32>
    %42 = tpu.matmul %41, %40, %cst_18 {dimension_numbers = #tpu.dot_dimension_numbers<[1], [1], [0], [0], [0, 0, 1, 0], [], []>} : vector<1x128xf32>, vector<128x128xf32>, vector<1x128xf32> -> vector<1x128xf32>
    %c0_19 = arith.constant 0 : index
    %c0_20 = arith.constant 0 : index
    %43 = vector.load %arg8[%c0_19, %c0_20] : memref<1x1xf32, #tpu.memory_space<vmem>>, vector<1x1xf32>
    %44 = vector.broadcast %43 : vector<1x1xf32> to vector<1x128xf32>
    %45 = arith.addf %42, %44 : vector<1x128xf32>
    %46 = tpu.iota {dimensions = array<i32: 1>} : vector<1x128xi32>
    %47 = vector.broadcast %5 : i32 to vector<1x128xi32>
    %48 = arith.addi %47, %46 : vector<1x128xi32>
    %c600_i32_21 = arith.constant 600 : i32
    %49 = vector.broadcast %c600_i32_21 : i32 to vector<1x128xi32>
    %50 = arith.cmpi slt, %48, %49 : vector<1x128xi32>
    %cst_22 = arith.constant -1.000000e+30 : f32
    %51 = vector.broadcast %cst_22 : f32 to vector<1x128xf32>
    %52 = arith.select %50, %45, %51 : vector<1x128xi1>, vector<1x128xf32>
    %c0_23 = arith.constant 0 : index
    %c0_24 = arith.constant 0 : index
    %53 = vector.load %arg9[%c0_23, %c0_24] : memref<1x128xf32, #tpu.memory_space<vmem>>, vector<1x128xf32>
    tpu.vector_store %arg9[%c0_23, %c0_24], %52 {strides = array<i32>} : memref<1x128xf32, #tpu.memory_space<vmem>>, vector<1x128xf32>,
    %cst_25 = arith.constant dense<0xFF800000> : vector<1xf32>
    %54 = vector.multi_reduction <maximumf>, %52, %cst_25 [1] : vector<1x128xf32> to vector<1xf32>
    %55 = vector.shape_cast %54 : vector<1xf32> to vector<1x1xf32>
    %c0_26 = arith.constant 0 : index
    %c0_27 = arith.constant 0 : index
    %c0_28 = arith.constant 0 : index
    %56 = vector.load %arg10[%c0_26, %c0_27, %c0_28] : memref<1x1x1xf32, #tpu.memory_space<vmem>>, vector<1x1x1xf32>
    %57 = vector.shape_cast %56 : vector<1x1x1xf32> to vector<1x1xf32>
    %58 = arith.maximumf %57, %55 : vector<1x1xf32>
    %59 = arith.subf %57, %58 : vector<1x1xf32>
    %60 = math.exp %59 : vector<1x1xf32>
    %61 = vector.broadcast %58 : vector<1x1xf32> to vector<1x128xf32>
    %62 = arith.subf %52, %61 : vector<1x128xf32>
    %63 = math.exp %62 : vector<1x128xf32>
    %c0_29 = arith.constant 0 : index
    %c0_30 = arith.constant 0 : index
    %c0_31 = arith.constant 0 : index
    %64 = vector.load %arg11[%c0_29, %c0_30, %c0_31] : memref<1x1x1xf32, #tpu.memory_space<vmem>>, vector<1x1x1xf32>
    %65 = vector.shape_cast %64 : vector<1x1x1xf32> to vector<1x1xf32>
    %66 = arith.mulf %60, %65 : vector<1x1xf32>
    %cst_32 = arith.constant dense<0.000000e+00> : vector<1xf32>
    %67 = vector.multi_reduction <add>, %63, %cst_32 [1] : vector<1x128xf32> to vector<1xf32>
    %68 = vector.shape_cast %67 : vector<1xf32> to vector<1x1xf32>
    %69 = arith.addf %66, %68 : vector<1x1xf32>
    %c0_33 = arith.constant 0 : index
    %c0_34 = arith.constant 0 : index
    %c0_35 = arith.constant 0 : index
    %70 = vector.load %arg11[%c0_33, %c0_34, %c0_35] : memref<1x1x1xf32, #tpu.memory_space<vmem>>, vector<1x1x1xf32>
    %71 = vector.shape_cast %70 : vector<1x1x1xf32> to vector<1x1xf32>
    %72 = vector.shape_cast %69 : vector<1x1xf32> to vector<1x1x1xf32>
    tpu.vector_store %arg11[%c0_33, %c0_34, %c0_35], %72 {strides = array<i32>} : memref<1x1x1xf32, #tpu.memory_space<vmem>>, vector<1x1x1xf32>,
    %c0_36 = arith.constant 0 : index
    %c0_37 = arith.constant 0 : index
    %c0_38 = arith.constant 0 : index
    %73 = vector.load %arg12[%c0_36, %c0_37, %c0_38] : memref<1x1x128xf32, #tpu.memory_space<vmem>>, vector<1x1x128xf32>
    %74 = vector.shape_cast %73 : vector<1x1x128xf32> to vector<1x128xf32>
    %75 = vector.broadcast %60 : vector<1x1xf32> to vector<1x128xf32>
    %76 = arith.mulf %75, %74 : vector<1x128xf32>
    %77 = arith.truncf %63 : vector<1x128xf32> to vector<1x128xbf16>
    %cst_39 = arith.constant dense<0.000000e+00> : vector<1x128xf32>
    %78 = tpu.matmul %77, %24, %cst_39 {dimension_numbers = #tpu.dot_dimension_numbers<[1], [0], [0], [1], [0, 0, 1, 1], [], []>} : vector<1x128xbf16>, vector<128x128xbf16>, vector<1x128xf32> -> vector<1x128xf32>
    %79 = arith.addf %76, %78 : vector<1x128xf32>
    %c0_40 = arith.constant 0 : index
    %c0_41 = arith.constant 0 : index
    %c0_42 = arith.constant 0 : index
    %80 = vector.load %arg12[%c0_40, %c0_41, %c0_42] : memref<1x1x128xf32, #tpu.memory_space<vmem>>, vector<1x1x128xf32>
    %81 = vector.shape_cast %80 : vector<1x1x128xf32> to vector<1x128xf32>
    %82 = vector.shape_cast %79 : vector<1x128xf32> to vector<1x1x128xf32>
    tpu.vector_store %arg12[%c0_40, %c0_41, %c0_42], %82 {strides = array<i32>} : memref<1x1x128xf32, #tpu.memory_space<vmem>>, vector<1x1x128xf32>,
    %c0_43 = arith.constant 0 : index
    %c0_44 = arith.constant 0 : index
    %c0_45 = arith.constant 0 : index
    %83 = vector.load %arg10[%c0_43, %c0_44, %c0_45] : memref<1x1x1xf32, #tpu.memory_space<vmem>>, vector<1x1x1xf32>
    %84 = vector.shape_cast %83 : vector<1x1x1xf32> to vector<1x1xf32>
    %85 = vector.shape_cast %58 : vector<1x1xf32> to vector<1x1x1xf32>
    tpu.vector_store %arg10[%c0_43, %c0_44, %c0_45], %85 {strides = array<i32>} : memref<1x1x1xf32, #tpu.memory_space<vmem>>, vector<1x1x1xf32>,
    return
  }
  func.func @transform_0(%arg0: i32, %arg1: i32) -> (i32, i32) {
    %c3_i32 = arith.constant 3 : i32
    %0 = arith.muli %arg0, %c3_i32 : i32
    %1 = arith.addi %0, %arg1 : i32
    %c4_i32 = arith.constant 4 : i32
    %2 = arith.minsi %1, %c4_i32 : i32
    %c0_i32 = arith.constant 0 : i32
    %c0_i32_0 = arith.constant 0 : i32
    return %2, %c0_i32 : i32, i32
  }
  func.func @transform_1(%arg0: i32, %arg1: i32) -> (i32, i32) {
    %c0_i32 = arith.constant 0 : i32
    %c0_i32_0 = arith.constant 0 : i32
    %c0_i32_1 = arith.constant 0 : i32
    return %c0_i32, %c0_i32_0 : i32, i32
  }
  func.func @transform_2(%arg0: i32, %arg1: i32) -> (i32, i32) {
    %c0_i32 = arith.constant 0 : i32
    %c0_i32_0 = arith.constant 0 : i32
    %c0_i32_1 = arith.constant 0 : i32
    return %c0_i32, %c0_i32_0 : i32, i32
  }
  func.func @transform_3(%arg0: i32, %arg1: i32) -> (i32, i32) {
    %c0_i32 = arith.constant 0 : i32
    %c0_i32_0 = arith.constant 0 : i32
    %c0_i32_1 = arith.constant 0 : i32
    return %c0_i32, %c0_i32_0 : i32, i32
  }
  func.func @transform_4(%arg0: i32, %arg1: i32) -> (i32, i32) {
    %c0_i32 = arith.constant 0 : i32
    %c0_i32_0 = arith.constant 0 : i32
    %c0_i32_1 = arith.constant 0 : i32
    return %c0_i32, %c0_i32_0 : i32, i32
  }
  func.func @transform_5(%arg0: i32, %arg1: i32) -> (i32, i32) {
    %c0_i32 = arith.constant 0 : i32
    %c0_i32_0 = arith.constant 0 : i32
    %c0_i32_1 = arith.constant 0 : i32
    return %c0_i32, %c0_i32_0 : i32, i32
  }
  func.func @transform_6(%arg0: i32, %arg1: i32) -> (i32, i32) {
    %c0_i32 = arith.constant 0 : i32
    %c0_i32_0 = arith.constant 0 : i32
    %c0_i32_1 = arith.constant 0 : i32
    return %c0_i32, %c0_i32_0 : i32, i32
  }
  func.func @transform_7(%arg0: i32, %arg1: i32) -> (i32, i32) {
    %c3_i32 = arith.constant 3 : i32
    %0 = arith.muli %arg0, %c3_i32 : i32
    %1 = arith.addi %0, %arg1 : i32
    %c0_i32 = arith.constant 0 : i32
    %c0_i32_0 = arith.constant 0 : i32
    return %c0_i32, %1 : i32, i32
  }
  func.func @transform_8(%arg0: i32, %arg1: i32) -> (i32, i32, i32) {
    %c0_i32 = arith.constant 0 : i32
    %c0_i32_0 = arith.constant 0 : i32
    %c0_i32_1 = arith.constant 0 : i32
    return %arg0, %c0_i32, %c0_i32_0 : i32, i32, i32
  }
  func.func @transform_9(%arg0: i32, %arg1: i32) -> (i32, i32, i32) {
    %c0_i32 = arith.constant 0 : i32
    %c0_i32_0 = arith.constant 0 : i32
    %c0_i32_1 = arith.constant 0 : i32
    return %arg0, %c0_i32, %c0_i32_0 : i32, i32, i32
  }
  func.func @transform_10(%arg0: i32, %arg1: i32) -> (i32, i32, i32) {
    %c0_i32 = arith.constant 0 : i32
    %c0_i32_0 = arith.constant 0 : i32
    %c0_i32_1 = arith.constant 0 : i32
    return %arg0, %c0_i32, %c0_i32_0 : i32, i32, i32
  }
}

</mosaic_0001>

<bundles_post_ra>
// kernel: gated_attention_forward.1
= control target key start
LH: loop header
LB: loop body
LE: loop exit
PB: predicated region body
PF: predicated region fallthrough
CT: control target
= control target key end

     0   :  { %s2665_s0 = inlined_call_operand.hbm [shape: f32[600,256], index: 0, kind: input, shape index: {}]   ;;  %s2666_s1 = inlined_call_operand.vmem [shape: bf16[256,128], index: 1, kind: input, shape index: {}]   ;;  %s2667_s2 = inlined_call_operand.vmem [shape: f32[1,128], index: 2, kind: input, shape index: {}]   ;;  %s2668_s3 = inlined_call_operand.vmem [shape: bf16[128,256], index: 3, kind: input, shape index: {}]   ;;  %s2669_s4 = inlined_call_operand.vmem [shape: f32[1,256], index: 4, kind: input, shape index: {}]   ;;  %s2670_s5 = inlined_call_operand.vmem [shape: f32[1,128], index: 5, kind: input, shape index: {}]   ;;  %s2671_s6 = inlined_call_operand.<no memory space> [shape: f32[1,1], index: 6, kind: input, shape index: {}]   ;;  %s2672_s7 = inlined_call_operand.vmem [shape: f32[1,768], index: 7, kind: output, shape index: {0}]   ;;  %s2673_s8 = inlined_call_operand.vmem [shape: f32[2,1,1], index: 8, kind: output, shape index: {1}]   ;;  %s2674_s9 = inlined_call_operand.vmem [shape: f32[2,1,1], index: 9, kind: output, shape index: {2}]   ;;  %s2675_s10 = inlined_call_operand.vmem [shape: f32[2,1,128], index: 10, kind: output, shape index: {3}]  }
   0x1   :  { %2679 = sst [smem:[#allocation9_spill]] %s2665_s0  ;;  %v16_v0 = vstv %s2671_s6 }
   0x2   :  { %17 = vst [vmem:[#allocation2] sm:$0x1] %v16_v0 }
   0x3   :  { %18 = vsyncpa [#allocation4], 0 }
   0x4   :  { %20 = vsyncpa [#allocation4 + $0x1], 0  ;;  %s2098_s15 = smov 0   ;;  %s2100_s16 = smov 0  }
   0x5   :  { %s2102_s17 = smov 0   ;;  %s2104_s18 = smov 0  }
   0x6   :  { %s2106_s19 = smov 0   ;;  %s2108_s20 = smov 0  }
   0x7   :  { %s2110_s21 = smov 0   ;;  %s2112_s22 = smov 0  }
   0x8 LB: > { %2680 = sst [smem:[#allocation6_spill]] %s2026_s21  ;;  %s35_s6 = sadd.s32 1, %s2022_s20  ;;  %s2030_s22 = sphi %s2112_s22, %s26_s22   ;;  %s2026_s21 = sphi %s2110_s21, %s2701_s21   ;;  %s2022_s20 = sphi %s2108_s20, %s2706_s20   ;;  %s2018_s19 = sphi %s2106_s19, %s2699_s19   ;;  %s2014_s18 = sphi %s2104_s18, %s2705_s18   ;;  %s2010_s17 = sphi %s2102_s17, %s2704_s17   ;;  %s2006_s16 = sphi %s2100_s16, %s2703_s16   ;;  %s2002_s15 = sphi %s2098_s15, %s2702_s15  }
   0x9   : > { %p36_p0 = scmp.ge.s32.totalorder %s35_s6, 3  ;;  %s38_s23 = sadd.s32 1, %s2026_s21 }
   0xa   : > { %s1508_s24 = sadd.s32 4294967295, %s2030_s22   ;;  %s42_s25 = smul.u32 3, %s2026_s21 }
   0xb   : > { %s2708_s6 = smov (%p36_p0, %s35_s6), 0  ;;  %s2710_s23 = smov (!%p36_p0, %s38_s23), %s2026_s21 }
   0xc   : > { %2681 = sst [smem:[#allocation7_spill]] %s2708_s6  ;;  %s43_s26 = sadd.s32 %s2022_s20, %s42_s25 }
   0xd   : > { %p60_p1 = scmp.ne.s32.totalorder %s2010_s17, %s2006_s16  ;;  %p40_p2 = scmp.ge.s32.totalorder %s2710_s23, 2 }
   0xe   : > { %p44_p3 = scmp.lt.s32.totalorder %s43_s26, 4  ;;  %p61_p4 = scmp.eq.s32.totalorder %s2030_s22, 0 }
   0xf   : > { %p66_p5 = scmp.ne.s32.totalorder %s2006_s16, %s2002_s15  ;;  %s2712_s23 = smov (%p40_p2, %s2710_s23), 0 }
  0x10   : > { %2682 = sst [smem:[#allocation8_spill]] %s2712_s23  ;;  %s2714_s26 = smov (!%p44_p3, %s43_s26), 4 }
  0x11   : > { %s46_s27 = smul.u32 3, %s2712_s23  ;;  %p62_p6 = por %p61_p4, %p60_p1 }
  0x12   : > { %p67_p7 = scmp.eq.s32.totalorder %s1508_s24, 0  ;;  %s53_s11 = sadd.s32 1, %s2010_s17 }
  0x13   : > { %s47_s28 = sadd.s32 %s46_s27, %s2708_s6  ;;  %p1511_p11 = scmp.ge.s32.totalorder %s2030_s22, 6 }
  0x14   : > { %p48_p8 = scmp.lt.s32.totalorder %s47_s28, 4  ;;  %p2154_p9 = por %p67_p7, %p66_p5 }
  0x16   : > { %s2716_s28 = smov (!%p48_p8, %s47_s28), 4  ;;  %338 = sbr.rel (%p1511_p11) target bundleno = 65 (0x41), region = 40 }
  0x17   : > { %s50_s30 = ssub.s32 %s2714_s26, %s2716_s28 }
  0x18   : > { %p51_p10 = scmp.eq.s32.totalorder %s50_s30, 0 }
  0x1a   : > { %s2161_s12 = scalar_select %p51_p10, %s2010_s17, %s53_s11  }
  0x1b   : > { %341 = sbr.rel (!%p62_p6) target bundleno = 65 (0x41), region = 44  ;;  %s342_s13 = sand.u32 (%p62_p6), 1, %s2010_s17  }
  0x1c   : > { %s1513_s14 = sshll.u32 (%p62_p6), %s2714_s26, 4  ;;  %s1512_s15 = sshll.u32 (%p62_p6), %s342_s13, 8 }
  0x1d   : > { %s352_s24 = ssub.s32 (%p62_p6), 75, %s1513_s14  ;;  %s2169_s28 = scalar_lea.sflag (%p62_p6), [#allocation4], %s342_s13 }
  0x1e   : > { %p353_p12 = scmp.lt.s32.totalorder (%p62_p6), %s352_s24, 16  ;;  %s346_s30 = scalar_lea.vmem (%p62_p6), [#allocation3], %s1512_s15 }
  0x20   : > { %s2718_s24 = smov (!%p353_p12, %s352_s24), 16 }
  0x21   : > { %s2166_s25 = sshll.u32 %s2718_s24, 8 }
  0x22   : > { %s358_s27 = ssub.s32 4096, %s2166_s25 }
  0x23   : > { %359 = vsyncadd %s2169_s28, %s358_s27  ;;  %p1516_p13 = scmp.ne.s32.totalorder %s2166_s25, 0  ;;  %s1610_s11 = sshll.u32 %s2714_s26, 12 }
  0x24   : > { %s2684_s0 = sld [smem:[#allocation9_spill]]  ;;  %s365_s24 = sshll.u32 %s346_s30, 4  ;;  %s2179_s24 = int_to_ptr.vmem [resolvable:$true] %s365_s24 }
  0x2a   : > { %s2177_s14 = scalar_lea.hbm %s2684_s0, %s1610_s11  ;;  %s1942_s21 = scalar_lea.hbm %s2684_s0, 19200 }
  0x2b   : > { %s1938_s13 = scalar_lea.hbm %s2177_s14, %s2166_s25 }
  0x2c   : > { %p1939_p0 = scmp.ne.s32.totalorder %s2177_s14, %s1938_s13  ;;  %p1944_p3 = scmp.lt.s32.totalorder %s1942_s21, %s1938_s13 }
  0x2e   : > { %p1940_p1 = pnand %p1939_p0, %p1516_p13 }
  0x30   : > { %p1941_p2 = pneg %p1940_p1 }
  0x32   : > { %p1946_p4 = pnand %p1944_p3, %p1941_p2 }
  0x34   : > { %1949 = shalt.err (!%p1946_p4)
}
  0x35   : > { %s1950_s6 = scalar_lea.vmem %s2179_s24, %s2166_s25  ;;  %s2032_s23 = smov [#allocation3]  }
  0x36   : > { %p1951_p5 = scmp.ne.s32.totalorder %s2179_s24, %s1950_s6  ;;  %s1954_s26 = sshll.u32 %s2032_s23, 4  ;;  %s1955_s26 = int_to_ptr.vmem [resolvable:$false] %s1954_s26 }
  0x37   : > { %s1956_s30 = scalar_lea.vmem %s1955_s26, 8192  ;;  %p1957_p8 = scmp.lt.s32.totalorder %s2179_s24, %s1955_s26 }
  0x38   : > { %p1952_p6 = pnand %p1951_p5, %p1516_p13  ;;  %p1958_p10 = scmp.lt.s32.totalorder %s1956_s30, %s1950_s6 }
  0x3a   : > { %p1953_p7 = pneg %p1952_p6  ;;  %p1959_p11 = por %p1958_p10, %p1957_p8 }
  0x3c   : > { %p1960_p12 = pnand %p1959_p11, %p1953_p7 }
  0x3e   : > { %1963 = shalt.err (!%p1960_p12)
}
  0x3f   : > { %s2033_s21 = smov 256   ;;  %s2034_s11 = smov 16  }
  0x40   : > { %371 = dma.hbm_to_vmem [thread:$0]  (%p1516_p13), %s2177_s14, %s2166_s25, %s2179_s24, %s2169_s28, %s2033_s21, %s2033_s21, %s2034_s11  }
  0x41 PF: > { %p1521_p0 = scmp.ge.s32.totalorder %s2030_s22, 1  ;;  %p373_p1 = scmp.lt.s32.totalorder %s2030_s22, 7 }
  0x43   : > { %p374_p2 = pnand %p1521_p0, %p373_p1 }
  0x44   : > { %s379_s13 = sand.u32 (!%p374_p2), 1, %s2006_s16  }
  0x45   : > { %377 = sbr.rel (%p374_p2) target bundleno = 1353 (0x549), region = 48  ;;  %s1522_s15 = sshll.u32 (!%p374_p2), %s379_s13, 8 }
  0x46   : > { %s380_s27 = scalar_lea.sflag (!%p374_p2), [#allocation4], %s379_s13  ;;  %s2204_s6 = scalar_lea.vmem (!%p374_p2), [#allocation3], %s1522_s15 }
  0x4a   : > { %1997 = dma.done.wait (%p2154_p9), %s380_s27, 4096  }
  0x4b   : > { %1999 = vsyncadd (%p2154_p9), %s380_s27, 4294963200  ;;  %s439_s25 = smul.u32 3, %s2018_s19  ;;  %p446_p13 = scmp.lt.s32.totalorder %s2018_s19, 1 }
  0x4c   : > { %p1523_p9 = scmp.ne.s32.totalorder %s2014_s18, 0 }
  0x4d   : > { %s2213_s28 = sadd.s32 %s2014_s18, %s439_s25  ;;  %s2720_s19 = smov (!%p446_p13, %s2018_s19), 1 }
  0x4e   : > { %p441_p3 = scmp.lt.s32.totalorder %s2213_s28, 5  ;;  %s2223_s29 = scalar_lea.vmem %s2673_s8, %s2720_s19 }
  0x4f   : > { %s2228_s21 = scalar_lea.vmem %s2674_s9, %s2720_s19  ;;  %s2237_s0 = scalar_lea.vmem %s2675_s10, %s2720_s19 }
  0x50   : > { %s2218_s14 = scalar_select %p441_p3, %s2213_s28, 5 }
  0x51   : > { %459 = sbr.rel (%p1523_p9) target bundleno = 89 (0x59), region = 56 }
  0x52   : > { %s443_s15 = scalar_lea.vmem %s2672_s7, %s2218_s14 }
  0x56   : > { %vm460_vm0 = vcmask 0   ;;  %v2035_v1 = vmov -inf   ;;  %v2036_v2 = vmov 0.0  }
  0x57   : > { %461 = vst.msk [vmem:[%s2223_s29] sm:$0x1] %vm460_vm0, %v2035_v1  ;;  %462 = vst.msk [vmem:[%s2228_s21] sm:$0x1] %vm460_vm0, %v2036_v2 }
  0x58   : > { %463 = vst [vmem:[%s2237_s0] sm:$0x1] %v2036_v2 }
  0x59 PF: > { %v1830_v3 = vld [vmem:[%s2666_s1 + $0x78] sm:$0xff]   ;;  %v1832_v5 = vld [vmem:[%s2666_s1 + $0x70] sm:$0xff]   ;;  %v1834_v7 = vld [vmem:[%s2666_s1 + $0x68] sm:$0xff]   ;;  %s1524_s19 = sshll.u32 %s2213_s28, 7 }
  0x5a   : > { %v1831_v4 = vld [vmem:[%s2666_s1 + $0x38] sm:$0xff]   ;;  %1611 = vmatprep.subr.bf16.mxu0 %v1830_v3  ;;  %v1833_v6 = vld [vmem:[%s2666_s1 + $0x30] sm:$0xff]   ;;  %v1835_v8 = vld [vmem:[%s2666_s1 + $0x28] sm:$0xff]  }
  0x5b   : > { %1612 = vmatpush3.bf16.msra.mxu0 %v1831_v4  ;;  %v1836_v9 = vld [vmem:[%s2666_s1 + $0x60] sm:$0xff]   ;;  %v1838_v11 = vld [vmem:[%s2666_s1 + $0x58] sm:$0xff]   ;;  %v1840_v13 = vld [vmem:[%s2666_s1 + $0x50] sm:$0xff]  }
  0x5c   : > { %1613 = vmatprep.subr.bf16.mxu0 %v1832_v5  ;;  %v1837_v10 = vld [vmem:[%s2666_s1 + $0x20] sm:$0xff]   ;;  %v1839_v12 = vld [vmem:[%s2666_s1 + $0x18] sm:$0xff]   ;;  %v468_v14 = vld [vmem:[%s2204_s6 + $0x8] sm:$0xff] }
  0x5d   : > { %v470_v15 = vld [vmem:[%s2204_s6 + $0x18] sm:$0xff]  ;;  %v1841_v17 = vld [vmem:[%s2666_s1 + $0x10] sm:$0xff]   ;;  %v1842_v18 = vld [vmem:[%s2666_s1 + $0x48] sm:$0xff]  }
  0x5e   : > { %v500_v16 = vpack.c.bf16 %v470_v15, %v468_v14  ;;  %v1843_v19 = vld [vmem:[%s2666_s1 + $0x8] sm:$0xff]   ;;  %v1844_v20 = vld [vmem:[%s2666_s1 + $0x40] sm:$0xff]   ;;  %v469_v23 = vld [vmem:[%s2204_s6 + $0x10] sm:$0xff] }
  0x5f   : > { %1614 = vmatpush3.bf16.msra.mxu0 %v1833_v6  ;;  %v1845_v21 = vld [vmem:[%s2666_s1] sm:$0xff]   ;;  %v472_v24 = vld [vmem:[%s2204_s6 + $0x28] sm:$0xff]  ;;  %v1846_v26 = vld [vmem:[%s2668_s3 + $0x74] ss:$8 sps:$4 sm:$0xff]  }
  0x60   : > { %1615 = vmatprep.subr.bf16.mxu0 %v1834_v7  ;;  %682 = vmatprep.mubr.bf16.mxu0 %v500_v16  ;;  %v467_v22 = vld [vmem:[%s2204_s6] sm:$0xff]  ;;  %v474_v25 = vld [vmem:[%s2204_s6 + $0x38] sm:$0xff]  ;;  %v473_v35 = vld [vmem:[%s2204_s6 + $0x30] sm:$0xff] }
  0x61   : > { %v1848_v27 = vld [vmem:[%s2668_s3 + $0x70] ss:$8 sps:$4 sm:$0xff]   ;;  %v1849_v28 = vld [vmem:[%s2668_s3 + $0x64] ss:$8 sps:$4 sm:$0xff]   ;;  %977 = vmatprep.subr.bf16.mxu1 %v1846_v26  ;;  %v499_v29 = vpack.c.bf16 %v469_v23, %v467_v22  ;;  %v1851_v30 = vld [vmem:[%s2668_s3 + $0x60] ss:$8 sps:$4 sm:$0xff]   ;;  %v502_v31 = vpack.c.bf16 %v474_v25, %v472_v24  ;;  %v2381_v25 = vstv %s1524_s19 }
  0x62   : > { %978 = vmatpush1.bf16.msra.mxu1 %v1848_v27  ;;  %v1852_v32 = vld [vmem:[%s2668_s3 + $0x54] ss:$8 sps:$4 sm:$0xff]   ;;  %v1854_v33 = vld [vmem:[%s2668_s3 + $0x50] ss:$8 sps:$4 sm:$0xff]   ;;  %v471_v34 = vld [vmem:[%s2204_s6 + $0x20] sm:$0xff] }
  0x63   : > { %1616 = vmatpush3.bf16.msra.mxu0 %v1835_v8  ;;  %979 = vmatprep.subr.bf16.mxu1 %v1849_v28  ;;  %v1855_v36 = vld [vmem:[%s2668_s3 + $0x44] ss:$8 sps:$4 sm:$0xff]   ;;  %v478_v38 = vld [vmem:[%s2204_s6 + $0x58] sm:$0xff]  ;;  %v501_v39 = vpack.c.bf16 %v473_v35, %v471_v34  ;;  %v477_v44 = vld [vmem:[%s2204_s6 + $0x50] sm:$0xff] }
  0x64   : > { %1617 = vmatprep.subr.bf16.mxu0 %v1836_v9  ;;  %v476_v37 = vld [vmem:[%s2204_s6 + $0x48] sm:$0xff]  ;;  %v1858_v42 = vld [vmem:[%s2668_s3 + $0x34] ss:$8 sps:$4 sm:$0xff]   ;;  %v475_v43 = vld [vmem:[%s2204_s6 + $0x40] sm:$0xff] }
  0x65   : > { %v1857_v40 = vld [vmem:[%s2668_s3 + $0x40] ss:$8 sps:$4 sm:$0xff]   ;;  %v504_v41 = vpack.c.bf16 %v478_v38, %v476_v37  ;;  %v503_v47 = vpack.c.bf16 %v477_v44, %v475_v43  ;;  %v481_v50 = vld [vmem:[%s2204_s6 + $0x70] sm:$0xff] }
  0x66   : > { %980 = vmatpush1.bf16.msra.mxu1 %v1851_v30  ;;  %v480_v45 = vld [vmem:[%s2204_s6 + $0x68] sm:$0xff]  ;;  %v482_v46 = vld [vmem:[%s2204_s6 + $0x78] sm:$0xff]  ;;  %v479_v49 = vld [vmem:[%s2204_s6 + $0x60] sm:$0xff] }
  0x67   : > { %1618 = vmatpush3.bf16.msra.mxu0 %v1837_v10  ;;  %981 = vmatprep.subr.bf16.mxu1 %v1852_v32  ;;  %v506_v48 = vpack.c.bf16 %v482_v46, %v480_v45  ;;  %v484_v51 = vld [vmem:[%s2204_s6 + $0x88] sm:$0xff]  ;;  %v486_v52 = vld [vmem:[%s2204_s6 + $0x98] sm:$0xff]  ;;  %v505_v53 = vpack.c.bf16 %v481_v50, %v479_v49  ;;  %v483_v55 = vld [vmem:[%s2204_s6 + $0x80] sm:$0xff] }
  0x68   : > { %1619 = vmatprep.subr.bf16.mxu0 %v1838_v11  ;;  %v508_v54 = vpack.c.bf16 %v486_v52, %v484_v51  ;;  %v485_v56 = vld [vmem:[%s2204_s6 + $0x90] sm:$0xff]  ;;  %v488_v57 = vld [vmem:[%s2204_s6 + $0xa8] sm:$0xff]  ;;  %v490_v58 = vld [vmem:[%s2204_s6 + $0xb8] sm:$0xff] }
  0x69   : > { %v507_v59 = vpack.c.bf16 %v485_v56, %v483_v55  ;;  %v510_v60 = vpack.c.bf16 %v490_v58, %v488_v57  ;;  %v487_v61 = vld [vmem:[%s2204_s6 + $0xa0] sm:$0xff]  ;;  %v489_v62 = vld [vmem:[%s2204_s6 + $0xb0] sm:$0xff]  ;;  %v492_v63 = vld [vmem:[%s2204_s6 + $0xc8] sm:$0xff] }
  0x6a   : > { %982 = vmatpush1.bf16.msra.mxu1 %v1854_v33  ;;  %v494_v0 = vld [vmem:[%s2204_s6 + $0xd8] sm:$0xff]  ;;  %v509_v1 = vpack.c.bf16 %v489_v62, %v487_v61  ;;  %v491_v3 = vld [vmem:[%s2204_s6 + $0xc0] sm:$0xff]  ;;  %v493_v4 = vld [vmem:[%s2204_s6 + $0xd0] sm:$0xff] }
  0x6b   : > { %1620 = vmatpush3.bf16.msra.mxu0 %v1839_v12  ;;  %983 = vmatprep.subr.bf16.mxu1 %v1855_v36  ;;  %v512_v2 = vpack.c.bf16 %v494_v0, %v492_v63  ;;  %v496_v5 = vld [vmem:[%s2204_s6 + $0xe8] sm:$0xff]  ;;  %v498_v6 = vld [vmem:[%s2204_s6 + $0xf8] sm:$0xff]  ;;  %v511_v7 = vpack.c.bf16 %v493_v4, %v491_v3  ;;  %v495_v9 = vld [vmem:[%s2204_s6 + $0xe0] sm:$0xff] }
  0x6c   : > { %1621 = vmatprep.subr.bf16.mxu0 %v1840_v13  ;;  %v514_v8 = vpack.c.bf16 %v498_v6, %v496_v5  ;;  %v497_v10 = vld [vmem:[%s2204_s6 + $0xf0] sm:$0xff]  ;;  %v1861_v13 = vld [vmem:[%s2668_s3 + $0x24] ss:$8 sps:$4 sm:$0xff]   ;;  %v1863_v14 = vld [vmem:[%s2668_s3 + $0x20] ss:$8 sps:$4 sm:$0xff]  }
  0x6d   : > { %v513_v11 = vpack.c.bf16 %v497_v10, %v495_v9  ;;  %v1860_v12 = vld [vmem:[%s2668_s3 + $0x30] ss:$8 sps:$4 sm:$0xff]   ;;  %v1864_v15 = vld [vmem:[%s2668_s3 + $0x14] ss:$8 sps:$4 sm:$0xff]   ;;  %v2386_v28 = vld [vmem:[%s2667_s2] ss:$0 sm:$0xff] }
  0x6e   : > { %984 = vmatpush1.bf16.msra.mxu1 %v1857_v40  ;;  %v1866_v16 = vld [vmem:[%s2668_s3 + $0x10] ss:$8 sps:$4 sm:$0xff]  }
  0x6f   : > { %1622 = vmatpush3.bf16.msra.mxu0 %v1841_v17  ;;  %985 = vmatprep.subr.bf16.mxu1 %v1858_v42  ;;  %v1867_v17 = vld [vmem:[%s2668_s3 + $0x4] ss:$8 sps:$4 sm:$0xff]  }
  0x70   : > { %1623 = vmatprep.subr.bf16.mxu0 %v1842_v18  ;;  %v1869_v18 = vld [vmem:[%s2668_s3] ss:$8 sps:$4 sm:$0xff]  }
  0x72   : > { %986 = vmatpush1.bf16.msra.mxu1 %v1860_v12 }
  0x73   : > { %1624 = vmatpush3.bf16.msra.mxu0 %v1843_v19  ;;  %987 = vmatprep.subr.bf16.mxu1 %v1861_v13  ;;  %v2037_v19 = vmov 0  }
  0x74   : > { %1625 = vmatprep.subr.bf16.mxu0 %v1844_v20  ;;  %1009 = vmatprep.mubr.bf16.mxu1 %v2037_v19  ;;  %v2038_v20 = vmov 0.0  }
  0x75   : > { %1828 = vset.pattern.permute.xlu0 %v2037_v19  ;;  %1829 = vset.pattern.permute.xlu1 %v2037_v19 }
  0x76   : > { %988 = vmatpush1.bf16.msra.mxu1 %v1863_v14 }
  0x77   : > { %1626 = vmatpush3.bf16.msra.mxu0 %v1845_v21  ;;  %989 = vmatprep.subr.bf16.mxu1 %v1864_v15  ;;  %v763_v21 = vlaneseq }
  0x78   : > { %1701 = vmatprep.subr.mxu0 %v2038_v20 }
  0x79   : > { %v2377_v22 = vshrl.u32 %v763_v21, 7 }
  0x7a   : > { %683 = vmatmul.mubr.bf16.vlgmr.msra.gmra.mxu0 %v499_v29  ;;  %990 = vmatpush1.bf16.msra.mxu1 %v1866_v16 }
  0x7b   : > { %690 = vmatprep.mubr.bf16.mxu0 %v502_v31  ;;  %991 = vmatprep.subr.bf16.mxu1 %v1867_v17  ;;  %v765_v24 = vadd.s32 8, %v2377_v22  ;;  %v781_v30 = vadd.s32 %v2381_v25, %v2377_v22  ;;  %v766_v37 = vadd.s32 16, %v2377_v22  ;;  %v767_v38 = vadd.s32 24, %v2377_v22 }
  0x7c   : > { %v768_v52 = vadd.s32 32, %v2377_v22  ;;  %v770_v5 = vadd.s32 48, %v2377_v22  ;;  %v771_v6 = vadd.s32 56, %v2377_v22  ;;  %v2526_v12 = vsub.s32 0, %v2377_v22 }
  0x7d   : > { %v782_v31 = vadd.s32 %v2381_v25, %v765_v24  ;;  %vm797_vm1 = vcmp.lt.s32.totalorder %v781_v30, 600  ;;  %v783_v46 = vadd.s32 %v2381_v25, %v766_v37  ;;  %v772_v24 = vadd.s32 64, %v2377_v22 }
  0x7e   : > { %992 = vmatpush1.bf16.msra.mxu1 %v1869_v18  ;;  %v785_v61 = vadd.s32 %v2381_v25, %v768_v52  ;;  %v787_v14 = vadd.s32 %v2381_v25, %v770_v5  ;;  %v788_v15 = vadd.s32 %v2381_v25, %v771_v6  ;;  %v1187_v6 = vld [vmem:[#allocation2] sm:$0x1] }
  0x7f   : > { %1736 = vmatprep.subr.bf16.mxu1 %v2038_v20  ;;  %vm798_vm2 = vcmp.lt.s32.totalorder %v782_v31, 600  ;;  %vm799_vm4 = vcmp.lt.s32.totalorder %v783_v46, 600  ;;  %v775_v46 = vadd.s32 88, %v2377_v22  ;;  %1190 = vperm.xlu0 %1828, %v1187_v6  }
  0x80   : > { %vm2395_vm3 = vmpackc.low %vm798_vm2, %vm797_vm1  ;;  %vm801_vm7 = vcmp.lt.s32.totalorder %v785_v61, 600  ;;  %vm803_vm10 = vcmp.lt.s32.totalorder %v787_v14, 600  ;;  %vm804_vm11 = vcmp.lt.s32.totalorder %v788_v15, 600  ;;  %v776_v61 = vadd.s32 96, %v2377_v22 }
  0x81   : > { %vm2443_vm12 = vmpackc.low %vm804_vm11, %vm803_vm10 }
  0x82   : > { %691 = vmatmul.mubr.bf16.gmra.mxu0 %v501_v39 }
  0x83   : > { %698 = vmatprep.mubr.bf16.mxu0 %v504_v41 }
  0x8a   : > { %699 = vmatmul.mubr.bf16.gmra.mxu0 %v503_v47  ;;  %v784_v47 = vadd.s32 %v2381_v25, %v767_v38 }
  0x8b   : > { %706 = vmatprep.mubr.bf16.mxu0 %v506_v48 }
  0x8c   : > { %vm800_vm5 = vcmp.lt.s32.totalorder %v784_v47, 600 }
  0x8d   : > { %vm2411_vm6 = vmpackc.low %vm800_vm5, %vm799_vm4 }
  0x92   : > { %707 = vmatmul.mubr.bf16.gmra.mxu0 %v505_v53 }
  0x93   : > { %714 = vmatprep.mubr.bf16.mxu0 %v508_v54  ;;  %v769_v54 = vadd.s32 40, %v2377_v22 }
  0x95   : > { %v786_v63 = vadd.s32 %v2381_v25, %v769_v54 }
  0x97   : > { %vm802_vm8 = vcmp.lt.s32.totalorder %v786_v63, 600 }
  0x98   : > { %vm2427_vm9 = vmpackc.low %vm802_vm8, %vm801_vm7 }
  0x9a   : > { %715 = vmatmul.mubr.bf16.gmra.mxu0 %v507_v59 }
  0x9b   : > { %722 = vmatprep.mubr.bf16.mxu0 %v510_v60 }
  0xa2   : > { %723 = vmatmul.mubr.bf16.gmra.mxu0 %v509_v1 }
  0xa3   : > { %730 = vmatprep.mubr.bf16.mxu0 %v512_v2 }
  0xaa   : > { %731 = vmatmul.mubr.bf16.gmra.mxu0 %v511_v7 }
  0xab   : > { %738 = vmatprep.mubr.bf16.mxu0 %v514_v8 }
  0xb2   : > { %739 = vmatmul.mubr.bf16.gmra.mxu0 %v513_v11 }
 0x13a   : > { %v1627_v23 = vpop.f32.mrf.mxu0 }
 0x13c   : > { %v1628_v26 = vpop.f32.mrf.mxu0 }
 0x13d   : > { %v1629_v27 = vadd.f32 %v1628_v26, %v1627_v23 }
 0x13e   : > { %v1630_v29 = vpop.f32.mrf.mxu0 }
 0x13f   : > { %v685_v33 = vadd.f32 %v1629_v27, %v2386_v28  ;;  %v773_v27 = vadd.s32 72, %v2377_v22 }
 0x140   : > { %v1631_v32 = vpop.f32.mrf.mxu0 }
 0x141   : > { %v1632_v34 = vadd.f32 %v1631_v32, %v1630_v29  ;;  %v747_v40 = vmax.f32 %v685_v33, 0.0  ;;  %v790_v37 = vadd.s32 %v2381_v25, %v773_v27 }
 0x142   : > { %v1633_v35 = vpop.f32.mrf.mxu0 }
 0x143   : > { %v688_v36 = vadd.f32 %v1632_v34, %v2386_v28  ;;  %vm806_vm14 = vcmp.lt.s32.totalorder %v790_v37, 600 }
 0x144   : > { %v1634_v39 = vpop.f32.mrf.mxu0 }
 0x145   : > { %v748_v41 = vmax.f32 %v688_v36, 0.0  ;;  %v1635_v42 = vadd.f32 %v1634_v39, %v1633_v35  ;;  %v789_v35 = vadd.s32 %v2381_v25, %v772_v24 }
 0x146   : > { %v1636_v43 = vpop.f32.mrf.mxu0 }
 0x147   : > { %v2399_v45 = vpack.c.bf16 %v748_v41, %v747_v40  ;;  %v693_v49 = vadd.f32 %v1635_v42, %v2386_v28  ;;  %vm805_vm13 = vcmp.lt.s32.totalorder %v789_v35, 600 }
 0x148   : > { %v1637_v48 = vpop.f32.mrf.mxu0  ;;  %vm2459_vm15 = vmpackc.low %vm806_vm14, %vm805_vm13 }
 0x149   : > { %v1638_v50 = vadd.f32 %v1637_v48, %v1636_v43  ;;  %1560 = vmatmul.mubr.msk.bf16.vlgmr.msra.gmra.mxu1 %vm2395_vm3, %v2399_v45  ;;  %v749_v56 = vmax.f32 %v693_v49, 0.0  ;;  %v774_v43 = vadd.s32 80, %v2377_v22 }
 0x14a   : > { %v1639_v51 = vpop.f32.mrf.mxu0  ;;  %1019 = vmatprep.mubr.bf16.mxu1 %v2037_v19 }
 0x14b   : > { %v696_v53 = vadd.f32 %v1638_v50, %v2386_v28  ;;  %v791_v54 = vadd.s32 %v2381_v25, %v774_v43 }
 0x14c   : > { %v1640_v55 = vpop.f32.mrf.mxu0 }
 0x14d   : > { %v750_v57 = vmax.f32 %v696_v53, 0.0  ;;  %v1641_v58 = vadd.f32 %v1640_v55, %v1639_v51  ;;  %v792_v55 = vadd.s32 %v2381_v25, %v775_v46  ;;  %vm807_vm0 = vcmp.lt.s32.totalorder %v791_v54, 600 }
 0x14e   : > { %v1642_v59 = vpop.f32.mrf.mxu0 }
 0x14f   : > { %v2416_v62 = vpack.c.bf16 %v750_v57, %v749_v56  ;;  %v701_v1 = vadd.f32 %v1641_v58, %v2386_v28  ;;  %vm808_vm1 = vcmp.lt.s32.totalorder %v792_v55, 600 }
 0x150   : > { %v1643_v0 = vpop.f32.mrf.mxu0  ;;  %vm2472_vm2 = vmpackc.low %vm808_vm1, %vm807_vm0 }
 0x151   : > { %v1644_v2 = vadd.f32 %v1643_v0, %v1642_v59  ;;  %1563 = vmatmul.mubr.msk.bf16.gmra.mxu1 %vm2411_vm6, %v2416_v62  ;;  %v751_v8 = vmax.f32 %v701_v1, 0.0  ;;  %v777_v0 = vadd.s32 104, %v2377_v22 }
 0x152   : > { %v1645_v3 = vpop.f32.mrf.mxu0  ;;  %1029 = vmatprep.mubr.bf16.mxu1 %v2037_v19 }
 0x153   : > { %v704_v4 = vadd.f32 %v1644_v2, %v2386_v28 }
 0x154   : > { %v1646_v7 = vpop.f32.mrf.mxu0 }
 0x155   : > { %v752_v9 = vmax.f32 %v704_v4, 0.0  ;;  %v1647_v10 = vadd.f32 %v1646_v7, %v1645_v3  ;;  %v793_v7 = vadd.s32 %v2381_v25, %v776_v61 }
 0x156   : > { %v1648_v11 = vpop.f32.mrf.mxu0 }
 0x157   : > { %v2431_v13 = vpack.c.bf16 %v752_v9, %v751_v8  ;;  %v709_v17 = vadd.f32 %v1647_v10, %v2386_v28  ;;  %v794_v9 = vadd.s32 %v2381_v25, %v777_v0  ;;  %vm809_vm4 = vcmp.lt.s32.totalorder %v793_v7, 600 }
 0x158   : > { %v1649_v16 = vpop.f32.mrf.mxu0 }
 0x159   : > { %v1650_v18 = vadd.f32 %v1649_v16, %v1648_v11  ;;  %1566 = vmatmul.mubr.msk.bf16.gmra.mxu1 %vm2427_vm9, %v2431_v13  ;;  %v753_v30 = vmax.f32 %v709_v17, 0.0  ;;  %vm810_vm5 = vcmp.lt.s32.totalorder %v794_v9, 600  ;;  %v778_v17 = vadd.s32 112, %v2377_v22 }
 0x15a   : > { %v1651_v23 = vpop.f32.mrf.mxu0  ;;  %1039 = vmatprep.mubr.bf16.mxu1 %v2037_v19  ;;  %vm2485_vm7 = vmpackc.low %vm810_vm5, %vm809_vm4 }
 0x15b   : > { %v712_v26 = vadd.f32 %v1650_v18, %v2386_v28  ;;  %v779_v18 = vadd.s32 120, %v2377_v22 }
 0x15c   : > { %v1652_v29 = vpop.f32.mrf.mxu0 }
 0x15d   : > { %v754_v31 = vmax.f32 %v712_v26, 0.0  ;;  %v1653_v32 = vadd.f32 %v1652_v29, %v1651_v23 }
 0x15e   : > { %v1654_v33 = vpop.f32.mrf.mxu0 }
 0x15f   : > { %v2448_v36 = vpack.c.bf16 %v754_v31, %v753_v30  ;;  %v717_v39 = vadd.f32 %v1653_v32, %v2386_v28  ;;  %v795_v32 = vadd.s32 %v2381_v25, %v778_v17 }
 0x160   : > { %v1655_v38 = vpop.f32.mrf.mxu0 }
 0x161   : > { %v1656_v40 = vadd.f32 %v1655_v38, %v1654_v33  ;;  %1569 = vmatmul.mubr.msk.bf16.gmra.mxu1 %vm2443_vm12, %v2448_v36  ;;  %v755_v48 = vmax.f32 %v717_v39, 0.0  ;;  %v796_v33 = vadd.s32 %v2381_v25, %v779_v18  ;;  %vm811_vm8 = vcmp.lt.s32.totalorder %v795_v32, 600 }
 0x162   : > { %v1657_v41 = vpop.f32.mrf.mxu0  ;;  %1049 = vmatprep.mubr.bf16.mxu1 %v2037_v19 }
 0x163   : > { %v720_v42 = vadd.f32 %v1656_v40, %v2386_v28  ;;  %vm812_vm10 = vcmp.lt.s32.totalorder %v796_v33, 600 }
 0x164   : > { %v1658_v47 = vpop.f32.mrf.mxu0  ;;  %vm1579_vm11 = vmpackc.low %vm812_vm10, %vm811_vm8 }
 0x165   : > { %v756_v49 = vmax.f32 %v720_v42, 0.0  ;;  %v1659_v50 = vadd.f32 %v1658_v47, %v1657_v41 }
 0x166   : > { %v1660_v51 = vpop.f32.mrf.mxu0 }
 0x167   : > { %v1571_v53 = vpack.c.bf16 %v756_v49, %v755_v48  ;;  %v725_v57 = vadd.f32 %v1659_v50, %v2386_v28 }
 0x168   : > { %v1661_v56 = vpop.f32.mrf.mxu0 }
 0x169   : > { %v1662_v58 = vadd.f32 %v1661_v56, %v1660_v51  ;;  %1572 = vmatmul.mubr.msk.bf16.gmra.mxu1 %vm2459_vm15, %v1571_v53  ;;  %v757_v2 = vmax.f32 %v725_v57, 0.0 }
 0x16a   : > { %v1663_v59 = vpop.f32.mrf.mxu0  ;;  %1059 = vmatprep.mubr.bf16.mxu1 %v2037_v19 }
 0x16b   : > { %v728_v63 = vadd.f32 %v1662_v58, %v2386_v28 }
 0x16c   : > { %v1664_v1 = vpop.f32.mrf.mxu0 }
 0x16d   : > { %v758_v3 = vmax.f32 %v728_v63, 0.0  ;;  %v1665_v4 = vadd.f32 %v1664_v1, %v1663_v59 }
 0x16e   : > { %v1666_v5 = vpop.f32.mrf.mxu0 }
 0x16f   : > { %v1574_v8 = vpack.c.bf16 %v758_v3, %v757_v2  ;;  %v733_v11 = vadd.f32 %v1665_v4, %v2386_v28 }
 0x170   : > { %v1667_v10 = vpop.f32.mrf.mxu0 }
 0x171   : > { %v1668_v14 = vadd.f32 %v1667_v10, %v1666_v5  ;;  %1575 = vmatmul.mubr.msk.bf16.gmra.mxu1 %vm2472_vm2, %v1574_v8  ;;  %v759_v24 = vmax.f32 %v733_v11, 0.0 }
 0x172   : > { %v1669_v15 = vpop.f32.mrf.mxu0  ;;  %1069 = vmatprep.mubr.bf16.mxu1 %v2037_v19 }
 0x173   : > { %v736_v16 = vadd.f32 %v1668_v14, %v2386_v28 }
 0x174   : > { %v1670_v23 = vpop.f32.mrf.mxu0 }
 0x175   : > { %v760_v26 = vmax.f32 %v736_v16, 0.0  ;;  %v1671_v27 = vadd.f32 %v1670_v23, %v1669_v15 }
 0x176   : > { %v1672_v29 = vpop.f32.mrf.mxu0 }
 0x177   : > { %v1577_v31 = vpack.c.bf16 %v760_v26, %v759_v24  ;;  %v741_v37 = vadd.f32 %v1671_v27, %v2386_v28 }
 0x178   : > { %v1673_v35 = vpop.f32.mrf.mxu0 }
 0x179   : > { %v1674_v38 = vadd.f32 %v1673_v35, %v1672_v29  ;;  %1578 = vmatmul.mubr.msk.bf16.gmra.mxu1 %vm2485_vm7, %v1577_v31  ;;  %v761_v40 = vmax.f32 %v741_v37, 0.0 }
 0x17a   : > { %1079 = vmatprep.mubr.bf16.mxu1 %v2037_v19  ;;  %v893_v19 = vsub.s32 1, %v2377_v22 }
 0x17b   : > { %v744_v39 = vadd.f32 %v1674_v38, %v2386_v28  ;;  %v885_v28 = vld [vmem:[%s2669_s4] sm:$0x3] }
 0x17c   : > { %v2531_v60 = vrot.slane %v885_v28, %v2526_v12 }
 0x17d   : > { %v762_v41 = vmax.f32 %v744_v39, 0.0 }
 0x17f   : > { %v1580_v42 = vpack.c.bf16 %v762_v41, %v761_v40 }
 0x181   : > { %1581 = vmatmul.mubr.msk.bf16.gmra.mxu1 %vm1579_vm11, %v1580_v42 }
 0x182   : > { %1737 = vmatpush3.bf16.msk.msra.mxu1 %vm1579_vm11, %v1580_v42 }
 0x183   : > { %1738 = vmatprep.subr.bf16.mxu1 %v2038_v20 }
 0x186   : > { %1739 = vmatpush3.bf16.msk.msra.mxu1 %vm2485_vm7, %v1577_v31 }
 0x187   : > { %1740 = vmatprep.subr.bf16.mxu1 %v2038_v20 }
 0x18a   : > { %1741 = vmatpush3.bf16.msk.msra.mxu1 %vm2472_vm2, %v1574_v8 }
 0x18b   : > { %1742 = vmatprep.subr.bf16.mxu1 %v2038_v20 }
 0x18e   : > { %1743 = vmatpush3.bf16.msk.msra.mxu1 %vm2459_vm15, %v1571_v53 }
 0x18f   : > { %1744 = vmatprep.subr.bf16.mxu1 %v2038_v20 }
 0x192   : > { %1745 = vmatpush3.bf16.msk.msra.mxu1 %vm2443_vm12, %v2448_v36  ;;  %vm1300_vm12 = vcmask 0  }
 0x193   : > { %1746 = vmatprep.subr.bf16.mxu1 %v2038_v20 }
 0x196   : > { %1747 = vmatpush3.bf16.msk.msra.mxu1 %vm2427_vm9, %v2431_v13  ;;  %v2528_v13 = vrot.slane %v885_v28, %v893_v19  ;;  %vm1273_vm9 = vcmask 1040384  }
 0x197   : > { %1748 = vmatprep.subr.bf16.mxu1 %v2038_v20 }
 0x19a   : > { %1749 = vmatpush3.bf16.msk.msra.mxu1 %vm2411_vm6, %v2416_v62 }
 0x19b   : > { %1750 = vmatprep.subr.bf16.mxu1 %v2038_v20 }
 0x19e   : > { %1751 = vmatpush3.bf16.msk.msra.mxu1 %vm2395_vm3, %v2399_v45  ;;  %vm2039_vm3 = vmmov 0  }
 0x19f   : > { %1733 = vmatprep.mubr.msk.f32.mxu0 %vm2039_vm3, %v2038_v20  ;;  %1752 = vmatprep.mubr.msk.bf16.mxu1 %vm2039_vm3, %v2038_v20 }
 0x209   : > { %v1011_v34 = vpop.f32.mrf.mxu1 }
 0x20a   : > { %v1012_v43 = vadd.f32 %v1011_v34, %v2531_v60 }
 0x20b   : > { %v1013_v62 = vpop.f32.mrf.mxu1 }
 0x20c   : > { %v1014_v36 = vadd.f32 %v1013_v62, %v2528_v13 }
 0x20d   : > { %v1015_v44 = vpop.f32.mrf.mxu1 }
 0x20e   : > { %v1106_v45 = vmul.f32 0.5, %v1014_v36  ;;  %v1016_v49 = vadd.f32 %v1015_v44, %v2531_v60 }
 0x20f   : > { %v1017_v46 = vpop.f32.mrf.mxu1 }
 0x210   : > { %1870 = vtanh.f32 %v1106_v45  ;;  %v1018_v47 = vadd.f32 %v1017_v46, %v2528_v13 }
 0x211   : > { %v1021_v48 = vpop.f32.mrf.mxu1  ;;  %1872 = vtanh.f32 %v1012_v43 }
 0x212   : > { %v1107_v22 = vmul.f32 0.5, %v1018_v47  ;;  %v1022_v54 = vadd.f32 %v1021_v48, %v2531_v60 }
 0x213   : > { %v1023_v50 = vpop.f32.mrf.mxu1 }
 0x214   : > { %1874 = vtanh.f32 %v1107_v22  ;;  %v1024_v51 = vadd.f32 %v1023_v50, %v2528_v13 }
 0x215   : > { %v1025_v52 = vpop.f32.mrf.mxu1  ;;  %1876 = vtanh.f32 %v1016_v49 }
 0x216   : > { %v1108_v53 = vmul.f32 0.5, %v1024_v51  ;;  %v1026_v59 = vadd.f32 %v1025_v52, %v2531_v60 }
 0x217   : > { %v1027_v55 = vpop.f32.mrf.mxu1 }
 0x218   : > { %1878 = vtanh.f32 %v1108_v53  ;;  %v1028_v56 = vadd.f32 %v1027_v55, %v2528_v13 }
 0x219   : > { %v1031_v57 = vpop.f32.mrf.mxu1  ;;  %1880 = vtanh.f32 %v1022_v54 }
 0x21a   : > { %v1109_v58 = vmul.f32 0.5, %v1028_v56  ;;  %v1032_v4 = vadd.f32 %v1031_v57, %v2531_v60 }
 0x21b   : > { %v1033_v61 = vpop.f32.mrf.mxu1 }
 0x21c   : > { %1882 = vtanh.f32 %v1109_v58  ;;  %v1034_v63 = vadd.f32 %v1033_v61, %v2528_v13 }
 0x21d   : > { %v1871_v0 = vpop.eup %1870  ;;  %v1035_v1 = vpop.f32.mrf.mxu1  ;;  %1884 = vtanh.f32 %v1026_v59 }
 0x21e   : > { %v1138_v2 = vmul.f32 0.5, %v1871_v0  ;;  %v1110_v3 = vmul.f32 0.5, %v1034_v63  ;;  %v1873_v7 = vpop.eup %1872  ;;  %v1036_v17 = vadd.f32 %v1035_v1, %v2531_v60 }
 0x21f   : > { %v1037_v5 = vpop.f32.mrf.mxu1 }
 0x220   : > { %v1154_v8 = vadd.f32 0.5, %v1138_v2  ;;  %1886 = vtanh.f32 %v1110_v3  ;;  %v1038_v9 = vadd.f32 %v1037_v5, %v2528_v13 }
 0x221   : > { %v1875_v10 = vpop.eup %1874  ;;  %v1041_v11 = vpop.f32.mrf.mxu1  ;;  %1888 = vtanh.f32 %v1032_v4 }
 0x222   : > { %v1139_v14 = vmul.f32 0.5, %v1875_v10  ;;  %v1111_v15 = vmul.f32 0.5, %v1038_v9  ;;  %v2546_v16 = vmul.f32 %v1873_v7, %v1154_v8  ;;  %v1877_v23 = vpop.eup %1876  ;;  %v1042_v33 = vadd.f32 %v1041_v11, %v2531_v60 }
 0x223   : > { %v1043_v18 = vpop.f32.mrf.mxu1 }
 0x224   : > { %v1155_v24 = vadd.f32 0.5, %v1139_v14  ;;  %1890 = vtanh.f32 %v1111_v15  ;;  %v1044_v26 = vadd.f32 %v1043_v18, %v2528_v13 }
 0x225   : > { %v1879_v27 = vpop.eup %1878  ;;  %v1045_v29 = vpop.f32.mrf.mxu1  ;;  %1892 = vtanh.f32 %v1036_v17 }
 0x226   : > { %v1140_v30 = vmul.f32 0.5, %v1879_v27  ;;  %v1112_v31 = vmul.f32 0.5, %v1044_v26  ;;  %v2550_v32 = vmul.f32 %v1877_v23, %v1155_v24  ;;  %v1881_v37 = vpop.eup %1880  ;;  %v1046_v44 = vadd.f32 %v1045_v29, %v2531_v60 }
 0x227   : > { %v1047_v35 = vpop.f32.mrf.mxu1 }
 0x228   : > { %v1156_v38 = vadd.f32 0.5, %v1140_v30  ;;  %1894 = vtanh.f32 %v1112_v31  ;;  %v1048_v39 = vadd.f32 %v1047_v35, %v2528_v13 }
 0x229   : > { %v1883_v40 = vpop.eup %1882  ;;  %v2554_v41 = vpop.f32.mrf.mxu1  ;;  %1896 = vtanh.f32 %v1042_v33 }
 0x22a   : > { %v1141_v42 = vmul.f32 0.5, %v1883_v40  ;;  %v1113_v19 = vmul.f32 0.5, %v1048_v39  ;;  %v2556_v28 = vmul.f32 %v1881_v37, %v1156_v38  ;;  %v1885_v62 = vpop.eup %1884 }
 0x22b   : > { %v2558_v34 = vpop.f32.mrf.mxu1 }
 0x22c   : > { %v1157_v36 = vadd.f32 0.5, %v1141_v42  ;;  %1898 = vtanh.f32 %v1113_v19 }
 0x22d   : > { %v1887_v45 = vpop.eup %1886  ;;  %v2561_v43 = vpop.f32.mrf.mxu1  ;;  %1900 = vtanh.f32 %v1046_v44 }
 0x22e   : > { %v1142_v46 = vmul.f32 0.5, %v1887_v45  ;;  %v2563_v47 = vmul.f32 %v1885_v62, %v1157_v36  ;;  %v1889_v22 = vpop.eup %1888 }
 0x22f   : > { %v1057_v48 = vpop.f32.mrf.mxu1 }
 0x230   : > { %v1158_v49 = vadd.f32 0.5, %v1142_v46  ;;  %v1058_v19 = vadd.f32 %v1057_v48, %v2528_v13  ;;  %v1054_v46 = vadd.f32 %v2558_v34, %v2528_v13 }
 0x231   : > { %v1891_v50 = vpop.eup %1890  ;;  %v2565_v51 = vpop.f32.mrf.mxu1 }
 0x232   : > { %v1143_v52 = vmul.f32 0.5, %v1891_v50  ;;  %v2567_v53 = vmul.f32 %v1889_v22, %v1158_v49  ;;  %v1893_v55 = vpop.eup %1892  ;;  %v1115_v22 = vmul.f32 0.5, %v1058_v19 }
 0x233   : > { %v1063_v54 = vpop.f32.mrf.mxu1 }
 0x234   : > { %v1159_v56 = vadd.f32 0.5, %v1143_v52  ;;  %v1064_v39 = vadd.f32 %v1063_v54, %v2528_v13 }
 0x235   : > { %v1895_v57 = vpop.eup %1894  ;;  %v1065_v58 = vpop.f32.mrf.mxu1 }
 0x236   : > { %v1144_v59 = vmul.f32 0.5, %v1895_v57  ;;  %v2569_v61 = vmul.f32 %v1893_v55, %v1159_v56  ;;  %v1897_v0 = vpop.eup %1896  ;;  %v1116_v62 = vmul.f32 0.5, %v1064_v39  ;;  %v1066_v54 = vadd.f32 %v1065_v58, %v2531_v60 }
 0x237   : > { %v1067_v63 = vpop.f32.mrf.mxu1  ;;  %v1114_v56 = vmul.f32 0.5, %v1054_v46 }
 0x238   : > { %v1160_v1 = vadd.f32 0.5, %v1144_v59  ;;  %v1068_v35 = vadd.f32 %v1067_v63, %v2528_v13 }
 0x239   : > { %v1899_v2 = vpop.eup %1898  ;;  %v1071_v3 = vpop.f32.mrf.mxu1 }
 0x23a   : > { %v1145_v4 = vmul.f32 0.5, %v1899_v2  ;;  %v2571_v5 = vmul.f32 %v1897_v0, %v1160_v1  ;;  %v1901_v8 = vpop.eup %1900  ;;  %v1117_v40 = vmul.f32 0.5, %v1068_v35  ;;  %v1072_v44 = vadd.f32 %v1071_v3, %v2531_v60 }
 0x23b   : > { %v1073_v6 = vpop.f32.mrf.mxu1  ;;  %v1062_v1 = vadd.f32 %v2565_v51, %v2531_v60 }
 0x23c   : > { %v1161_v7 = vadd.f32 0.5, %v1145_v4  ;;  %v1074_v29 = vadd.f32 %v1073_v6, %v2528_v13  ;;  %v1056_v4 = vadd.f32 %v2561_v43, %v2531_v60 }
 0x23d   : > { %v1075_v9 = vpop.f32.mrf.mxu1 }
 0x23e   : > { %v2573_v10 = vmul.f32 %v1901_v8, %v1161_v7  ;;  %v1118_v37 = vmul.f32 0.5, %v1074_v29  ;;  %v1076_v42 = vadd.f32 %v1075_v9, %v2531_v60 }
 0x23f   : > { %v1077_v11 = vpop.f32.mrf.mxu1 }
 0x240   : > { %v1078_v23 = vadd.f32 %v1077_v11, %v2528_v13  ;;  %v1052_v11 = vadd.f32 %v2554_v41, %v2531_v60 }
 0x241   : > { %v1081_v14 = vpop.f32.mrf.mxu1 }
 0x242   : > { %v1119_v30 = vmul.f32 0.5, %v1078_v23  ;;  %v1082_v38 = vadd.f32 %v1081_v14, %v2531_v60 }
 0x243   : > { %v1083_v15 = vpop.f32.mrf.mxu1 }
 0x244   : > { %v1084_v17 = vadd.f32 %v1083_v15, %v2528_v13 }
 0x245   : > { %v1085_v18 = vpop.f32.mrf.mxu1 }
 0x246   : > { %v1120_v24 = vmul.f32 0.5, %v1084_v17  ;;  %v1086_v33 = vadd.f32 %v1085_v18, %v2531_v60 }
 0x247   : > { %v1087_v26 = vpop.f32.mrf.mxu1 }
 0x248   : > { %v1088_v27 = vadd.f32 %v1087_v26, %v2528_v13  ;;  %1902 = vtanh.f32 %v1120_v24 }
 0x24a   : > { %v1121_v31 = vmul.f32 0.5, %v1088_v27 }
 0x24c   : > { %1904 = vtanh.f32 %v1121_v31 }
 0x24d   : > { %1906 = vtanh.f32 %v1119_v30 }
 0x24e   : > { %1908 = vtanh.f32 %v1086_v33 }
 0x24f   : > { %1910 = vtanh.f32 %v1118_v37 }
 0x250   : > { %1912 = vtanh.f32 %v1082_v38 }
 0x251   : > { %1914 = vtanh.f32 %v1117_v40 }
 0x252   : > { %1916 = vtanh.f32 %v1076_v42 }
 0x253   : > { %1918 = vtanh.f32 %v1116_v62 }
 0x254   : > { %1920 = vtanh.f32 %v1072_v44 }
 0x255   : > { %v1903_v36 = vpop.eup %1902  ;;  %1922 = vtanh.f32 %v1115_v22 }
 0x256   : > { %v1152_v49 = vmul.f32 0.5, %v1903_v36  ;;  %1924 = vtanh.f32 %v1066_v54  ;;  %v1294_v54 = vld [vmem:[%s2228_s21] sm:$0x1] }
 0x257   : > { %1926 = vtanh.f32 %v1114_v56 }
 0x258   : > { %v1168_v59 = vadd.f32 0.5, %v1152_v49  ;;  %1928 = vtanh.f32 %v1062_v1 }
 0x259   : > { %v1905_v45 = vpop.eup %1904  ;;  %1930 = vtanh.f32 %v1056_v4 }
 0x25a   : > { %v1153_v50 = vmul.f32 0.5, %v1905_v45  ;;  %v1907_v52 = vpop.eup %1906  ;;  %1932 = vtanh.f32 %v1052_v11 }
 0x25b   : > { %v1909_v48 = vpop.eup %1908  ;;  %v1151_v57 = vmul.f32 0.5, %v1907_v52 }
 0x25c   : > { %v1169_v55 = vadd.f32 0.5, %v1153_v50  ;;  %v1911_v0 = vpop.eup %1910 }
 0x25d   : > { %v1913_v13 = vpop.eup %1912  ;;  %v1150_v34 = vmul.f32 0.5, %v1911_v0  ;;  %v1167_v58 = vadd.f32 0.5, %v1151_v57 }
 0x25e   : > { %v1185_v63 = vmul.f32 %v1909_v48, %v1169_v55  ;;  %v1184_v2 = vmul.f32 %v1913_v13, %v1168_v59  ;;  %v1915_v3 = vpop.eup %1914 }
 0x25f   : > { %v1917_v6 = vpop.eup %1916  ;;  %v1149_v7 = vmul.f32 0.5, %v1915_v3  ;;  %v1166_v51 = vadd.f32 0.5, %v1150_v34 }
 0x260   : > { %1702 = vmatpush3.xpose.msra.mxu0 %v1185_v63  ;;  %v1183_v8 = vmul.f32 %v1917_v6, %v1167_v58  ;;  %v1919_v9 = vpop.eup %1918  ;;  %v1302_v63 = vld [vmem:[%s2237_s0] sm:$0x1] }
 0x261   : > { %1703 = vmatprep.subr.mxu0 %v2038_v20  ;;  %v1921_v14 = vpop.eup %1920  ;;  %v1148_v15 = vmul.f32 0.5, %v1919_v9  ;;  %v1165_v17 = vadd.f32 0.5, %v1149_v7 }
 0x262   : > { %v1182_v43 = vmul.f32 %v1921_v14, %v1166_v51  ;;  %v1923_v18 = vpop.eup %1922 }
 0x263   : > { %v1925_v23 = vpop.eup %1924  ;;  %v1147_v24 = vmul.f32 0.5, %v1923_v18  ;;  %v1164_v26 = vadd.f32 0.5, %v1148_v15 }
 0x264   : > { %1704 = vmatpush3.xpose.msra.mxu0 %v1184_v2  ;;  %v1181_v27 = vmul.f32 %v1925_v23, %v1165_v17  ;;  %v1927_v29 = vpop.eup %1926 }
 0x265   : > { %1705 = vmatprep.subr.mxu0 %v2038_v20  ;;  %v1929_v60 = vpop.eup %1928  ;;  %v1146_v41 = vmul.f32 0.5, %v1927_v29  ;;  %v1163_v30 = vadd.f32 0.5, %v1147_v24 }
 0x266   : > { %v1180_v31 = vmul.f32 %v1929_v60, %v1164_v26  ;;  %v1931_v33 = vpop.eup %1930 }
 0x267   : > { %v1162_v35 = vadd.f32 0.5, %v1146_v41  ;;  %v1179_v37 = vmul.f32 %v1931_v33, %v1163_v30  ;;  %v1933_v38 = vpop.eup %1932 }
 0x268   : > { %1706 = vmatpush3.xpose.msra.mxu0 %v1183_v8 }
 0x269   : > { %1707 = vmatprep.subr.mxu0 %v2038_v20  ;;  %v1178_v39 = vmul.f32 %v1933_v38, %v1162_v35 }
 0x26c   : > { %1708 = vmatpush3.xpose.msra.mxu0 %v1182_v43 }
 0x26d   : > { %1709 = vmatprep.subr.mxu0 %v2038_v20 }
 0x270   : > { %1710 = vmatpush3.xpose.msra.mxu0 %v1181_v27 }
 0x271   : > { %1711 = vmatprep.subr.mxu0 %v2038_v20 }
 0x274   : > { %1712 = vmatpush3.xpose.msra.mxu0 %v1180_v31 }
 0x275   : > { %1713 = vmatprep.subr.mxu0 %v2038_v20 }
 0x278   : > { %1714 = vmatpush3.xpose.msra.mxu0 %v1179_v37 }
 0x279   : > { %1715 = vmatprep.subr.mxu0 %v2038_v20 }
 0x27c   : > { %1716 = vmatpush3.xpose.msra.mxu0 %v1178_v39 }
 0x27d   : > { %1717 = vmatprep.subr.mxu0 %v2038_v20 }
 0x280   : > { %1718 = vmatpush3.xpose.msra.mxu0 %v2573_v10 }
 0x281   : > { %1719 = vmatprep.subr.mxu0 %v2038_v20 }
 0x284   : > { %1720 = vmatpush3.xpose.msra.mxu0 %v2571_v5 }
 0x285   : > { %1721 = vmatprep.subr.mxu0 %v2038_v20 }
 0x288   : > { %1722 = vmatpush3.xpose.msra.mxu0 %v2569_v61  ;;  %v1191_v61 = vpop.permute.xlu0 %1190 }
 0x289   : > { %1723 = vmatprep.subr.mxu0 %v2038_v20  ;;  %v1196_v5 = vrot.slane %v1191_v61, %v2526_v12 }
 0x28c   : > { %1724 = vmatpush3.xpose.msra.mxu0 %v2567_v53  ;;  %v1186_v53 = vld [vmem:[%s2670_s5] sm:$0x1] }
 0x28d   : > { %1725 = vmatprep.subr.mxu0 %v2038_v20 }
 0x290   : > { %1726 = vmatpush3.xpose.msra.mxu0 %v2563_v47  ;;  %v1268_v47 = vand.u32 127, %v763_v21  ;;  %v1277_v21 = vld [vmem:[%s2223_s29] sm:$0x1] }
 0x291   : > { %1727 = vmatprep.subr.mxu0 %v2038_v20 }
 0x294   : > { %1728 = vmatpush3.xpose.msra.mxu0 %v2556_v28  ;;  %v1269_v28 = vadd.s32 %v1268_v47, %v2381_v25 }
 0x295   : > { %1729 = vmatprep.subr.mxu0 %v2038_v20 }
 0x296   : > { %vm1270_vm6 = vcmp.lt.s32.totalorder %v1269_v28, 600 }
 0x298   : > { %1730 = vmatpush3.xpose.msra.mxu0 %v2550_v32 }
 0x299   : > { %1731 = vmatprep.subr.mxu0 %v2038_v20 }
 0x29c   : > { %1732 = vmatpush3.xpose.msra.mxu0 %v2546_v16 }
 0x29f   : > { %1734 = vmatmul.mubr.f32.vlgmr.msra.gmra.mxu0 %v1186_v53 }
 0x35f   : > { %v1263_v10 = vpop.f32.mrf.mxu0 }
 0x360   : > { %v1264_v32 = vadd.f32 %v1263_v10, %v1196_v5 }
 0x361   : > { %v1735_v20 = vpop.f32.mrf.mxu0 }
 0x362   : > { %v1271_v16 = vsel %vm1270_vm6, %v1264_v32, -1e+30 }
 0x363   : > { %1272 = vst [vmem:[%s443_s15] sm:$0x1] %v1271_v16  ;;  %v1274_v40 = vsel %vm1273_vm9, %v1271_v16, -inf }
 0x364   : > { %1275 = vmax.xlane.f32.xlu0 %v1274_v40 }
 0x3ed   : > { %v1276_v25 = vpop.xlane.xlu0 %1275 }
 0x3ee   : > { %v1278_v42 = vmax.f32 %v1277_v21, %v1276_v25 }
 0x3f0   : > { %v1279_v19 = vsub.f32 %v1277_v21, %v1278_v42  ;;  %1356 = vst.msk [vmem:[%s2223_s29] sm:$0x1] %vm1300_vm12, %v1278_v42  ;;  %1284 = vperm.xlu1 %1829, %v1278_v42  }
 0x3f2   : > { %v1280_v62 = vmul.f32 1.442695, %v1279_v19 }
 0x3f4   : > { %1934 = vpow2.f32 %v1280_v62 }
 0x401   : > { %v1935_v36 = vpop.eup %1934 }
 0x402   : > { %1305 = vperm.xlu0 %1828, %v1935_v36   ;;  %v1295_v55 = vmul.f32 %v1935_v36, %v1294_v54 }
 0x46b   : > { %v1285_v44 = vpop.permute.xlu1 %1284 }
 0x46c   : > { %v1290_v45 = vrot.slane %v1285_v44, %v2526_v12 }
 0x46e   : > { %v1291_v46 = vsub.f32 %v1271_v16, %v1290_v45 }
 0x470   : > { %v1292_v22 = vmul.f32 1.442695, %v1291_v46 }
 0x472   : > { %1936 = vpow2.f32 %v1292_v22 }
 0x47d   : > { %v1306_v57 = vpop.permute.xlu0 %1305 }
 0x47e   : > { %v1311_v59 = vrot.slane %v1306_v57, %v2526_v12 }
 0x47f   : > { %v1937_v49 = vpop.eup %1936 }
 0x480   : > { %v1296_v50 = vsel %vm1273_vm9, %v1937_v49, 0.0  ;;  %v1313_v52 = vpack.c.bf16 %v1937_v49, %v1937_v49  ;;  %v1312_v0 = vmul.f32 %v1311_v59, %v1302_v63 }
 0x481   : > { %1297 = vadd.xlane.f32.xlu1 %v1296_v50 }
 0x482   : > { %1753 = vmatmul.mubr.bf16.vlgmr.msra.gmra.mxu1 %v1313_v52 }
 0x50a   : > { %v1298_v48 = vpop.xlane.xlu1 %1297 }
 0x50b   : > { %v1299_v56 = vadd.f32 %v1298_v48, %v1295_v55 }
 0x50d   : > { %1301 = vst.msk [vmem:[%s2228_s21] sm:$0x1] %vm1300_vm12, %v1299_v56 }
 0x542   : > { %v1348_v1 = vpop.f32.mrf.mxu1 }
 0x543   : > { %v1354_v13 = vadd.f32 %v1348_v1, %v1312_v0 }
 0x544   : > { %v1754_v34 = vpop.f32.mrf.mxu1 }
 0x545   : > { %1355 = vst [vmem:[%s2237_s0] sm:$0x1] %v1354_v13 }
 0x546   : > { %v1351_v58 = vpop.f32.mrf.mxu1 }
 0x548   : > { %v1755_v2 = vpop.f32.mrf.mxu1 }
 0x549 PF: > { %s26_s22 = sadd.s32 1, %s2030_s22   ;;  %s2699_s19 = sld [smem:[#allocation6_spill]] }
 0x54a   : > { %p23_p4 = scmp.ge.s32.totalorder %s26_s22, 8   ;;  %s2700_s14 = sld [smem:[#allocation7_spill]] }
 0x54b   : > { %s2701_s21 = sld [smem:[#allocation8_spill]]  ;;  %s2702_s15 = smov %s2006_s16 }
 0x54c   : > { %s2703_s16 = smov %s2010_s17  ;;  %s2704_s17 = smov %s2161_s12 }
 0x54d   : > { %s2705_s18 = smov %s2022_s20  ;;  %25 = sbr.rel (!%p23_p4) target bundleno = 8 (0x8), region = 128 }
 0x550   : > { %s2706_s20 = smov %s2700_s14 }
 0x552   :  { %1416 = vsyncpa [#allocation4], 1 }
 0x553   :  { %1418 = vsyncpa [#allocation4 + $0x1], 1 }

</bundles_post_ra>
